<compile_context>
chip_gen: v6e
topology: v6e:2x2x1
jax: 0.10.0
libtpu: 0.0.40
codegen_flags: <defaults>
</compile_context>

<pallas_src>
import math

import jax
import jax.numpy as jnp
from jax import lax
from jax.experimental import pallas as pl
from jax.experimental.pallas import tpu as pltpu

# ----------------------------- "config file" -------------------------------
ANCHORS_ALL = [(10.0, 14.0), (23.0, 27.0), (37.0, 58.0),
               (81.0, 82.0), (135.0, 169.0), (344.0, 319.0)]
ANCHOR_MASKS = {0: (0, 1, 2), 1: (3, 4, 5)}   # yolo layer idx -> anchor idxs
NUM_CLASSES = 3
IMG_DIM = 32.0
IGNORE_THRES = 0.5
LAMBDA_XY, LAMBDA_WH, LAMBDA_CONF, LAMBDA_CLS = 10.0, 10.0, 1.0, 10.0

# ------------------------------ tiling constants ----------------------------
LANES = 128
SUBLANES = 8
NCORES = 2            # leading "parallel" grid axis (v7x megacore; no-op elsewhere)
MAX_BLOCK_ROWS = 512  # 512*128 = 64K positions/step (~4 MB/buffer, fits v5e scoped VMEM)
N_SUMS = 9            # number of reduction quantities
N_TGT = 7             # tx, ty, tw, th, obj, noobj, label


def _round_up(x, m):
    return ((x + m - 1) // m) * m


# ------------------------------ Pallas kernel ------------------------------
def make_yolo_sums_kernel(G, nA, stride, anchors_px, num_classes,
                          block_rows, steps):
    """Masked reduction partial-sums for one YOLO layer.

    refs:
      pred_ref : (C+5, block_rows, 128)  raw predictions, channel-major
      tgt_ref  : (7,   block_rows, 128)  tx, ty, tw, th, obj, noobj, label(f32)
      out_ref  : (1, 9, 8, 128)          per-core partial-sum accumulators
    """
    inv_stride = 1.0 / float(stride)
    fG = float(G)
    fA = float(nA)

    def fdivmod(p, d):
        # Exact integer divmod for integer-valued f32 p (requires p < 2**24):
        # mul-by-reciprocal estimate + one correction step.
        q = jnp.floor(p * (1.0 / d))
        r = p - q * d
        q = jnp.where(r < 0.0, q - 1.0, q)
        q = jnp.where(r >= d, q + 1.0, q)
        return q, p - q * d

    def fold(x):
        # (block_rows, 128) -> (8, 128) with pure VPU vreg adds (no XLU).
        return jnp.sum(x.reshape(block_rows // SUBLANES, SUBLANES, LANES), axis=0)

    def kernel(pred_ref, tgt_ref, out_ref):
        g = pl.program_id(1)

        @pl.when(g == 0)
        def _():
            out_ref[...] = jnp.zeros_like(out_ref)

        # ---- reconstruct grid_x / grid_y / anchor index from flat position ----
        blk = pl.program_id(0) * steps + g                # global row-block index
        base = blk * (block_rows * LANES)
        row = lax.broadcasted_iota(jnp.int32, (block_rows, LANES), 0)
        col = lax.broadcasted_iota(jnp.int32, (block_rows, LANES), 1)
        pos = (base + row * LANES + col).astype(jnp.float32)

        q1, gx = fdivmod(pos, fG)        # gx = grid_i
        q2, gy = fdivmod(q1, fG)         # gy = grid_j
        _, af = fdivmod(q2, fA)          # af = anchor index (integer-valued f32)

        recip_aw = jnp.full((block_rows, LANES), 1.0 / anchors_px[nA - 1][0],
                            jnp.float32)
        recip_ah = jnp.full((block_rows, LANES), 1.0 / anchors_px[nA - 1][1],
                            jnp.float32)
        for a in range(nA - 1):
            is_a = af == float(a)
            recip_aw = jnp.where(is_a, 1.0 / anchors_px[a][0], recip_aw)
            recip_ah = jnp.where(is_a, 1.0 / anchors_px[a][1], recip_ah)

        # ---- unpack targets (single streamed slab) ----------------------------
        tx = tgt_ref[0]
        ty = tgt_ref[1]
        tw = tgt_ref[2]
        th = tgt_ref[3]
        obj = tgt_ref[4]
        noobj = tgt_ref[5]
        lbl = tgt_ref[6]

        # ---- box decoding (exactly as in YOLOLoss.forward) --------------------
        pred_x = (pred_ref[0] * inv_stride - gx + 0.5) * 0.5
        pred_y = (pred_ref[1] * inv_stride - gy + 0.5) * 0.5
        pred_w = jnp.sqrt(pred_ref[2] * recip_aw) * 0.5
        pred_h = jnp.sqrt(pred_ref[3] * recip_ah) * 0.5
        pconf = pred_ref[4]

        # ---- masked squared errors (MSE numerators) ---------------------------
        sx = obj * (pred_x - tx) ** 2
        sy = obj * (pred_y - ty) ** 2
        sw = obj * (pred_w - tw) ** 2
        sh = obj * (pred_h - th) ** 2

        # ---- BCE terms (log clamped at -100 like torch.nn.BCELoss) ------------
        log_p = jnp.maximum(jnp.log(pconf), -100.0)
        log_1mp = jnp.maximum(jnp.log(1.0 - pconf), -100.0)
        bce_obj = obj * (-log_p)           # conf target = 1 at obj positions
        bce_noobj = noobj * (-log_1mp)     # conf target = 0 at noobj positions

        cls_bce = jnp.zeros((block_rows, LANES), jnp.float32)
        for c in range(num_classes):
            pc = pred_ref[5 + c]
            log_pc = jnp.maximum(jnp.log(pc), -100.0)
            log_1mpc = jnp.maximum(jnp.log(1.0 - pc), -100.0)
            cls_bce = cls_bce - jnp.where(lbl == float(c), log_pc, log_1mpc)
        bce_cls = obj * cls_bce

        # ---- deferred reductions: accumulate (8,128) partials per quantity ----
        parts = (sx, sy, sw, sh, bce_obj, bce_noobj, bce_cls, obj, noobj)
        for k, v in enumerate(parts):
            out_ref[0, k] = out_ref[0, k] + fold(v)

    return kernel


def run_sums_pallas(pred_t, tgt_t, *, G, nA, stride, anchors_px,
                    num_classes, block_rows, steps):
    D = num_classes + 5
    grid_spec = pltpu.PrefetchScalarGridSpec(
        num_scalar_prefetch=0,
        grid=(NCORES, steps),
        in_specs=[pl.BlockSpec((D, block_rows, LANES),
                               lambda c, g: (0, c * steps + g, 0)),
                  pl.BlockSpec((N_TGT, block_rows, LANES),
                               lambda c, g: (0, c * steps + g, 0))],
        out_specs=pl.BlockSpec((1, N_SUMS, SUBLANES, LANES),
                               lambda c, g: (c, 0, 0, 0)),
    )
    partials = pl.pallas_call(
        make_yolo_sums_kernel(G, nA, stride, anchors_px, num_classes,
                              block_rows, steps),
        out_shape=jax.ShapeDtypeStruct((NCORES, N_SUMS, SUBLANES, LANES),
                                       jnp.float32),
        grid_spec=grid_spec,
        compiler_params=pltpu.CompilerParams(
            dimension_semantics=("parallel", "arbitrary")),
    )(pred_t, tgt_t)
    # Final (tiny) cross-lane reductions happen outside the kernel.
    return jnp.sum(partials, axis=(0, 2, 3))   # (9,)


def run_sums_reference(pred_t, tgt_t, *, G, nA, stride, anchors_px,
                       num_classes):
    """Pure-JAX reference of the kernel math (for in-script validation)."""
    D = num_classes + 5
    N_pad = pred_t.shape[1] * LANES
    predf = pred_t.reshape(D, N_pad)
    tgtf = tgt_t.reshape(N_TGT, N_pad)
    tx, ty, tw, th, obj, noobj, lbl = [tgtf[i] for i in range(N_TGT)]

    pos = jnp.arange(N_pad)
    gx = (pos % G).astype(jnp.float32)
    gy = ((pos // G) % G).astype(jnp.float32)
    a = (pos // (G * G)) % nA
    aw = jnp.asarray([w for w, _ in anchors_px], jnp.float32)[a]
    ah = jnp.asarray([h for _, h in anchors_px], jnp.float32)[a]

    pred_x = (predf[0] / stride - gx + 0.5) / 2.0
    pred_y = (predf[1] / stride - gy + 0.5) / 2.0
    pred_w = jnp.sqrt(predf[2] / aw) / 2.0
    pred_h = jnp.sqrt(predf[3] / ah) / 2.0
    pconf = predf[4]

    log_p = jnp.maximum(jnp.log(pconf), -100.0)
    log_1mp = jnp.maximum(jnp.log(1.0 - pconf), -100.0)

    cls_bce = jnp.zeros((N_pad,), jnp.float32)
    for c in range(num_classes):
        pc = predf[5 + c]
        is_c = lbl == float(c)
        cls_bce = cls_bce - jnp.where(is_c, jnp.maximum(jnp.log(pc), -100.0),
                                      jnp.maximum(jnp.log(1.0 - pc), -100.0))

    return jnp.stack([
        jnp.sum(obj * (pred_x - tx) ** 2),
        jnp.sum(obj * (pred_y - ty) ** 2),
        jnp.sum(obj * (pred_w - tw) ** 2),
        jnp.sum(obj * (pred_h - th) ** 2),
        jnp.sum(obj * (-log_p)),
        jnp.sum(noobj * (-log_1mp)),
        jnp.sum(obj * cls_bce),
        jnp.sum(obj),
        jnp.sum(noobj),
    ])


# ------------------------------ JAX glue -----------------------------------
def build_targets_flat(target, scaled_anchors, B, nA, G, N, N_pad, ignore_thres):
    """build_targets, scattered directly into one flat padded (7, N_pad) buffer.

    Planes: 0:tx 1:ty 2:tw 3:th 4:obj 5:noobj 6:label(f32)
    """
    tgt_boxes = target[:, 2:6] * G
    gxy = tgt_boxes[:, :2]
    gwh = tgt_boxes[:, 2:]
    aw = scaled_anchors[:, 0:1]
    ah = scaled_anchors[:, 1:2]
    gw = gwh[:, 0]
    gh = gwh[:, 1]
    inter = jnp.minimum(aw, gw[None, :]) * jnp.minimum(ah, gh[None, :])
    union = (aw * ah + 1e-16) + gw[None, :] * gh[None, :] - inter
    ious = inter / union                                   # (nA, nT)
    best_n = jnp.argmax(ious, axis=0).astype(jnp.int32)
    b = target[:, 0].astype(jnp.int32)
    labels = target[:, 1].astype(jnp.int32)
    gx, gy = gxy[:, 0], gxy[:, 1]
    gi = jnp.clip(gxy[:, 0].astype(jnp.int32), 0, G - 1)
    gj = jnp.clip(gxy[:, 1].astype(jnp.int32), 0, G - 1)

    def flat(bb, aa, jj, ii):
        return ((bb * nA + aa) * G + jj) * G + ii

    idx_best = flat(b, best_n, gj, gi)
    nT = target.shape[0]
    idx_all = flat(jnp.repeat(b, nA),
                   jnp.tile(jnp.arange(nA, dtype=jnp.int32), nT),
                   jnp.repeat(gj, nA), jnp.repeat(gi, nA))
    ign_keep = jnp.where(ious.T.reshape(-1) > ignore_thres, 0.0, 1.0)

    planes = jnp.zeros((N_TGT, N_pad), jnp.float32)
    planes = planes.at[5, :N].set(1.0)                              # noobj init
    planes = planes.at[0, idx_best].set(gx - jnp.floor(gx))         # tx
    planes = planes.at[1, idx_best].set((gy - jnp.floor(gy) + 0.5) * 0.5)   # ty
    planes = planes.at[2, idx_best].set(
        jnp.sqrt(gw / scaled_anchors[best_n, 0]) * 0.5)             # tw
    planes = planes.at[3, idx_best].set(
        jnp.sqrt(gh / scaled_anchors[best_n, 1]) * 0.5)             # th
    planes = planes.at[4, idx_best].set(1.0)                        # obj
    planes = planes.at[5, idx_best].set(0.0)                        # noobj off
    planes = planes.at[5, idx_all].min(ign_keep)                    # ignore thres
    planes = planes.at[6, idx_best].set(labels.astype(jnp.float32)) # class label
    return planes


def finish_loss(sums, nC):
    sx, sy, sw, sh, bobj, bnoobj, bcls, n_obj, n_noobj = [sums[i] for i in range(9)]
    # NOTE: like the PyTorch module, this is NaN/Inf if a batch has no targets.
    loss_x = sx / n_obj
    loss_y = sy / n_obj
    loss_w = sw / n_obj
    loss_h = sh / n_obj
    loss_conf = bobj / n_obj + 100.0 * (bnoobj / n_noobj)
    loss_cls = bcls / (n_obj * nC)
    return (LAMBDA_XY * (loss_x + loss_y) + LAMBDA_WH * (loss_w + loss_h)
            + LAMBDA_CONF * loss_conf + LAMBDA_CLS * loss_cls)


def yolo_layer_loss(pred, targets, anchors, use_pallas=True):
    """One YOLOLoss layer. pred: (B, 1, nA*G*G, C+5)."""
    B = pred.shape[0]
    nA = len(anchors)
    D = NUM_CLASSES + 5
    G = int(round(math.sqrt(pred.shape[2] / nA)))
    stride = IMG_DIM / G
    N = B * nA * G * G

    # tiling: position axis -> (rows_pad, 128), split over (NCORES, steps).
    rows = -(-N // LANES)
    block_rows = min(MAX_BLOCK_ROWS, _round_up(-(-rows // NCORES), SUBLANES))
    rows_pad = _round_up(rows, NCORES * block_rows)
    steps = rows_pad // (NCORES * block_rows)
    N_pad = rows_pad * LANES
    # exact integer arithmetic in f32 inside the kernel needs N_pad < 2**24
    assert N_pad < (1 << 24), "position index exceeds exact f32 range"

    # channel-major padded predictions: (C+5, rows_pad, 128)
    # TODO(synk): have the upstream network emit channel-major activations so
    # this transpose (one extra HBM pass over pred) disappears.
    pred_flat = pred.reshape(N, D).astype(jnp.float32)
    pred_t = jnp.pad(pred_flat.T, ((0, 0), (0, N_pad - N)))
    pred_t = pred_t.reshape(D, rows_pad, LANES)

    anchors_px = tuple((float(w), float(h)) for w, h in anchors)
    scaled_anchors = jnp.asarray(anchors, jnp.float32) / stride

    tgt = build_targets_flat(targets, scaled_anchors, B, nA, G, N, N_pad,
                             IGNORE_THRES)
    tgt_t = tgt.reshape(N_TGT, rows_pad, LANES)

    if use_pallas:
        sums = run_sums_pallas(pred_t, tgt_t, G=G, nA=nA, stride=stride,
                               anchors_px=anchors_px, num_classes=NUM_CLASSES,
                               block_rows=block_rows, steps=steps)
    else:
        sums = run_sums_reference(pred_t, tgt_t, G=G, nA=nA, stride=stride,
                                  anchors_px=anchors_px,
                                  num_classes=NUM_CLASSES)
    return finish_loss(sums, NUM_CLASSES)


def yolo_loss_total(x_list, targets, use_pallas=True):
    """YOLOLoss_total.forward with targets."""
    L = len(x_list)
    total = jnp.float32(0.0)
    for i, pred in enumerate(x_list):
        yolo = L - 1 - i
        anchors = [ANCHORS_ALL[k] for k in ANCHOR_MASKS[yolo]]
        total = total + yolo_layer_loss(pred, targets, anchors, use_pallas)
    outputs = jnp.concatenate(x_list, axis=2)
    outputs = jnp.squeeze(outputs, axis=1)
    return outputs, total
    # TODO(synk): self.metrics (iou_scores, class_mask, precision/recall) are
    # side-effect diagnostics that do not affect the returned values; omitted.


# --------------------------------- main -------------------------------------
if __name__ == "__main__":
    key = jax.random.PRNGKey(0)
    B, nA, D = 2, 3, NUM_CLASSES + 5
    G0, G1 = 4, 8
    k0, k1 = jax.random.split(key)
    # Raw predictions kept in (0,1) so BCE / sqrt preconditions hold
    # (matches the implicit assumption of the PyTorch module).
    x0 = jax.random.uniform(k0, (B, 1, nA * G0 * G0, D), jnp.float32, 0.05, 0.95)
    x1 = jax.random.uniform(k1, (B, 1, nA * G1 * G1, D), jnp.float32, 0.05, 0.95)

    # targets: (nT, 6) = [batch_idx, class_label, cx, cy, w, h] (normalized)
    targets = jnp.array([
        [0.0, 0.0, 0.15, 0.15, 0.20, 0.30],
        [0.0, 1.0, 0.60, 0.40, 0.30, 0.20],
        [1.0, 2.0, 0.35, 0.70, 0.25, 0.25],
        [1.0, 0.0, 0.80, 0.85, 0.15, 0.20],
    ], jnp.float32)

    loss_fn = jax.jit(lambda xs, t: yolo_loss_total(xs, t, use_pallas=True))
    ref_fn = jax.jit(lambda xs, t: yolo_loss_total(xs, t, use_pallas=False))

    outputs, loss = loss_fn([x0, x1], targets)
    outputs, loss = jax.block_until_ready((outputs, loss))

    # sanity-check against pure-JAX reference of the same math
    _, loss_ref = ref_fn([x0, x1], targets)
    loss_ref = jax.block_until_ready(loss_ref)
    assert outputs.shape == (B, nA * G0 * G0 + nA * G1 * G1, D)
    assert jnp.allclose(loss, loss_ref, rtol=1e-3, atol=1e-3), (loss, loss_ref)

    print("KERNEL_OK")
</pallas_src>

<mosaic_0001>
module attributes {stable_mosaic.version = 11 : i64} {
  func.func @kernel(%arg0: i32, %arg1: i32, %arg2: memref<8x8x128xf32, #tpu.memory_space<vmem>>, %arg3: memref<7x8x128xf32, #tpu.memory_space<vmem>>, %arg4: memref<1x9x8x128xf32, #tpu.memory_space<vmem>>) attributes {dimension_semantics = [#tpu.dimension_semantics<parallel>, #tpu.dimension_semantics<arbitrary>], iteration_bounds = array<i64: 2, 1>, scalar_prefetch = 0 : i64, scratch_operands = 0 : i64, tpu.core_type = #tpu.core_type<tc>, window_params = [{transform_indices = @transform_0, window_bounds = array<i64: 8, 8, 128>}, {transform_indices = @transform_1, window_bounds = array<i64: 7, 8, 128>}, {transform_indices = @transform_2, window_bounds = array<i64: 1, 9, 8, 128>}]} {
    %c0_i32 = arith.constant 0 : i32
    %0 = arith.cmpi eq, %arg1, %c0_i32 : i32
    %1 = arith.extui %0 : i1 to i32
    %c0_i32_0 = arith.constant 0 : i32
    %2 = arith.cmpi ne, %1, %c0_i32_0 : i32
    scf.if %2 {
      %cst_172 = arith.constant 0.000000e+00 : f32
      %273 = vector.broadcast %cst_172 : f32 to vector<1x9x8x128xf32>
      %c0_173 = arith.constant 0 : index
      %c0_174 = arith.constant 0 : index
      %c0_175 = arith.constant 0 : index
      %c0_176 = arith.constant 0 : index
      %274 = vector.load %arg4[%c0_173, %c0_174, %c0_175, %c0_176] : memref<1x9x8x128xf32, #tpu.memory_space<vmem>>, vector<1x9x8x128xf32>
      tpu.vector_store %arg4[%c0_173, %c0_174, %c0_175, %c0_176], %273 {strides = array<i32>} : memref<1x9x8x128xf32, #tpu.memory_space<vmem>>, vector<1x9x8x128xf32>,
    } else {
    }
    %c1_i32 = arith.constant 1 : i32
    %3 = arith.muli %arg0, %c1_i32 : i32
    %4 = arith.addi %3, %arg1 : i32
    %c1024_i32 = arith.constant 1024 : i32
    %5 = arith.muli %4, %c1024_i32 : i32
    %6 = tpu.iota {dimensions = array<i32: 0>} : vector<8x128xi32>
    %7 = tpu.iota {dimensions = array<i32: 1>} : vector<8x128xi32>
    %c128_i32 = arith.constant 128 : i32
    %8 = vector.broadcast %c128_i32 : i32 to vector<8x128xi32>
    %9 = arith.muli %6, %8 : vector<8x128xi32>
    %10 = vector.broadcast %5 : i32 to vector<8x128xi32>
    %11 = arith.addi %10, %9 : vector<8x128xi32>
    %12 = arith.addi %11, %7 : vector<8x128xi32>
    %13 = arith.sitofp %12 : vector<8x128xi32> to vector<8x128xf32>
    %cst = arith.constant 1.250000e-01 : f32
    %14 = vector.broadcast %cst : f32 to vector<8x128xf32>
    %15 = arith.mulf %13, %14 : vector<8x128xf32>
    %16 = math.floor %15 : vector<8x128xf32>
    %cst_1 = arith.constant 8.000000e+00 : f32
    %17 = vector.broadcast %cst_1 : f32 to vector<8x128xf32>
    %18 = arith.mulf %16, %17 : vector<8x128xf32>
    %19 = arith.subf %13, %18 : vector<8x128xf32>
    %cst_2 = arith.constant 0.000000e+00 : f32
    %20 = vector.broadcast %cst_2 : f32 to vector<8x128xf32>
    %21 = arith.cmpf olt, %19, %20 : vector<8x128xf32>
    %cst_3 = arith.constant 1.000000e+00 : f32
    %22 = vector.broadcast %cst_3 : f32 to vector<8x128xf32>
    %23 = arith.subf %16, %22 : vector<8x128xf32>
    %24 = arith.select %21, %23, %16 : vector<8x128xi1>, vector<8x128xf32>
    %cst_4 = arith.constant 8.000000e+00 : f32
    %25 = vector.broadcast %cst_4 : f32 to vector<8x128xf32>
    %26 = arith.cmpf oge, %19, %25 : vector<8x128xf32>
    %cst_5 = arith.constant 1.000000e+00 : f32
    %27 = vector.broadcast %cst_5 : f32 to vector<8x128xf32>
    %28 = arith.addf %24, %27 : vector<8x128xf32>
    %29 = arith.select %26, %28, %24 : vector<8x128xi1>, vector<8x128xf32>
    %cst_6 = arith.constant 8.000000e+00 : f32
    %30 = vector.broadcast %cst_6 : f32 to vector<8x128xf32>
    %31 = arith.mulf %29, %30 : vector<8x128xf32>
    %32 = arith.subf %13, %31 : vector<8x128xf32>
    %cst_7 = arith.constant 1.250000e-01 : f32
    %33 = vector.broadcast %cst_7 : f32 to vector<8x128xf32>
    %34 = arith.mulf %29, %33 : vector<8x128xf32>
    %35 = math.floor %34 : vector<8x128xf32>
    %cst_8 = arith.constant 8.000000e+00 : f32
    %36 = vector.broadcast %cst_8 : f32 to vector<8x128xf32>
    %37 = arith.mulf %35, %36 : vector<8x128xf32>
    %38 = arith.subf %29, %37 : vector<8x128xf32>
    %cst_9 = arith.constant 0.000000e+00 : f32
    %39 = vector.broadcast %cst_9 : f32 to vector<8x128xf32>
    %40 = arith.cmpf olt, %38, %39 : vector<8x128xf32>
    %cst_10 = arith.constant 1.000000e+00 : f32
    %41 = vector.broadcast %cst_10 : f32 to vector<8x128xf32>
    %42 = arith.subf %35, %41 : vector<8x128xf32>
    %43 = arith.select %40, %42, %35 : vector<8x128xi1>, vector<8x128xf32>
    %cst_11 = arith.constant 8.000000e+00 : f32
    %44 = vector.broadcast %cst_11 : f32 to vector<8x128xf32>
    %45 = arith.cmpf oge, %38, %44 : vector<8x128xf32>
    %cst_12 = arith.constant 1.000000e+00 : f32
    %46 = vector.broadcast %cst_12 : f32 to vector<8x128xf32>
    %47 = arith.addf %43, %46 : vector<8x128xf32>
    %48 = arith.select %45, %47, %43 : vector<8x128xi1>, vector<8x128xf32>
    %cst_13 = arith.constant 8.000000e+00 : f32
    %49 = vector.broadcast %cst_13 : f32 to vector<8x128xf32>
    %50 = arith.mulf %48, %49 : vector<8x128xf32>
    %51 = arith.subf %29, %50 : vector<8x128xf32>
    %cst_14 = arith.constant 0.333333343 : f32
    %52 = vector.broadcast %cst_14 : f32 to vector<8x128xf32>
    %53 = arith.mulf %48, %52 : vector<8x128xf32>
    %54 = math.floor %53 : vector<8x128xf32>
    %cst_15 = arith.constant 3.000000e+00 : f32
    %55 = vector.broadcast %cst_15 : f32 to vector<8x128xf32>
    %56 = arith.mulf %54, %55 : vector<8x128xf32>
    %57 = arith.subf %48, %56 : vector<8x128xf32>
    %cst_16 = arith.constant 0.000000e+00 : f32
    %58 = vector.broadcast %cst_16 : f32 to vector<8x128xf32>
    %59 = arith.cmpf olt, %57, %58 : vector<8x128xf32>
    %cst_17 = arith.constant 1.000000e+00 : f32
    %60 = vector.broadcast %cst_17 : f32 to vector<8x128xf32>
    %61 = arith.subf %54, %60 : vector<8x128xf32>
    %62 = arith.select %59, %61, %54 : vector<8x128xi1>, vector<8x128xf32>
    %cst_18 = arith.constant 3.000000e+00 : f32
    %63 = vector.broadcast %cst_18 : f32 to vector<8x128xf32>
    %64 = arith.cmpf oge, %57, %63 : vector<8x128xf32>
    %cst_19 = arith.constant 1.000000e+00 : f32
    %65 = vector.broadcast %cst_19 : f32 to vector<8x128xf32>
    %66 = arith.addf %62, %65 : vector<8x128xf32>
    %67 = arith.select %64, %66, %62 : vector<8x128xi1>, vector<8x128xf32>
    %cst_20 = arith.constant 3.000000e+00 : f32
    %68 = vector.broadcast %cst_20 : f32 to vector<8x128xf32>
    %69 = arith.mulf %67, %68 : vector<8x128xf32>
    %70 = arith.subf %48, %69 : vector<8x128xf32>
    %cst_21 = arith.constant 0.0270270277 : f32
    %71 = vector.broadcast %cst_21 : f32 to vector<8x128xf32>
    %cst_22 = arith.constant 0.0172413792 : f32
    %72 = vector.broadcast %cst_22 : f32 to vector<8x128xf32>
    %cst_23 = arith.constant 0.000000e+00 : f32
    %73 = vector.broadcast %cst_23 : f32 to vector<8x128xf32>
    %74 = arith.cmpf oeq, %70, %73 : vector<8x128xf32>
    %cst_24 = arith.constant 1.000000e-01 : f32
    %75 = vector.broadcast %cst_24 : f32 to vector<8x128xf32>
    %76 = arith.select %74, %75, %71 : vector<8x128xi1>, vector<8x128xf32>
    %cst_25 = arith.constant 0.0714285746 : f32
    %77 = vector.broadcast %cst_25 : f32 to vector<8x128xf32>
    %78 = arith.select %74, %77, %72 : vector<8x128xi1>, vector<8x128xf32>
    %cst_26 = arith.constant 1.000000e+00 : f32
    %79 = vector.broadcast %cst_26 : f32 to vector<8x128xf32>
    %80 = arith.cmpf oeq, %70, %79 : vector<8x128xf32>
    %cst_27 = arith.constant 0.0434782617 : f32
    %81 = vector.broadcast %cst_27 : f32 to vector<8x128xf32>
    %82 = arith.select %80, %81, %76 : vector<8x128xi1>, vector<8x128xf32>
    %cst_28 = arith.constant 0.0370370373 : f32
    %83 = vector.broadcast %cst_28 : f32 to vector<8x128xf32>
    %84 = arith.select %80, %83, %78 : vector<8x128xi1>, vector<8x128xf32>
    %c0 = arith.constant 0 : index
    %c0_29 = arith.constant 0 : index
    %c0_30 = arith.constant 0 : index
    %85 = vector.load %arg3[%c0, %c0_29, %c0_30] : memref<7x8x128xf32, #tpu.memory_space<vmem>>, vector<1x8x128xf32>
    %86 = vector.shape_cast %85 : vector<1x8x128xf32> to vector<8x128xf32>
    %c1 = arith.constant 1 : index
    %c0_31 = arith.constant 0 : index
    %c0_32 = arith.constant 0 : index
    %87 = vector.load %arg3[%c1, %c0_31, %c0_32] : memref<7x8x128xf32, #tpu.memory_space<vmem>>, vector<1x8x128xf32>
    %88 = vector.shape_cast %87 : vector<1x8x128xf32> to vector<8x128xf32>
    %c2 = arith.constant 2 : index
    %c0_33 = arith.constant 0 : index
    %c0_34 = arith.constant 0 : index
    %89 = vector.load %arg3[%c2, %c0_33, %c0_34] : memref<7x8x128xf32, #tpu.memory_space<vmem>>, vector<1x8x128xf32>
    %90 = vector.shape_cast %89 : vector<1x8x128xf32> to vector<8x128xf32>
    %c3 = arith.constant 3 : index
    %c0_35 = arith.constant 0 : index
    %c0_36 = arith.constant 0 : index
    %91 = vector.load %arg3[%c3, %c0_35, %c0_36] : memref<7x8x128xf32, #tpu.memory_space<vmem>>, vector<1x8x128xf32>
    %92 = vector.shape_cast %91 : vector<1x8x128xf32> to vector<8x128xf32>
    %c4 = arith.constant 4 : index
    %c0_37 = arith.constant 0 : index
    %c0_38 = arith.constant 0 : index
    %93 = vector.load %arg3[%c4, %c0_37, %c0_38] : memref<7x8x128xf32, #tpu.memory_space<vmem>>, vector<1x8x128xf32>
    %94 = vector.shape_cast %93 : vector<1x8x128xf32> to vector<8x128xf32>
    %c5 = arith.constant 5 : index
    %c0_39 = arith.constant 0 : index
    %c0_40 = arith.constant 0 : index
    %95 = vector.load %arg3[%c5, %c0_39, %c0_40] : memref<7x8x128xf32, #tpu.memory_space<vmem>>, vector<1x8x128xf32>
    %96 = vector.shape_cast %95 : vector<1x8x128xf32> to vector<8x128xf32>
    %c6 = arith.constant 6 : index
    %c0_41 = arith.constant 0 : index
    %c0_42 = arith.constant 0 : index
    %97 = vector.load %arg3[%c6, %c0_41, %c0_42] : memref<7x8x128xf32, #tpu.memory_space<vmem>>, vector<1x8x128xf32>
    %98 = vector.shape_cast %97 : vector<1x8x128xf32> to vector<8x128xf32>
    %c0_43 = arith.constant 0 : index
    %c0_44 = arith.constant 0 : index
    %c0_45 = arith.constant 0 : index
    %99 = vector.load %arg2[%c0_43, %c0_44, %c0_45] : memref<8x8x128xf32, #tpu.memory_space<vmem>>, vector<1x8x128xf32>
    %100 = vector.shape_cast %99 : vector<1x8x128xf32> to vector<8x128xf32>
    %cst_46 = arith.constant 2.500000e-01 : f32
    %101 = vector.broadcast %cst_46 : f32 to vector<8x128xf32>
    %102 = arith.mulf %100, %101 : vector<8x128xf32>
    %103 = arith.subf %102, %32 : vector<8x128xf32>
    %cst_47 = arith.constant 5.000000e-01 : f32
    %104 = vector.broadcast %cst_47 : f32 to vector<8x128xf32>
    %105 = arith.addf %103, %104 : vector<8x128xf32>
    %cst_48 = arith.constant 5.000000e-01 : f32
    %106 = vector.broadcast %cst_48 : f32 to vector<8x128xf32>
    %107 = arith.mulf %105, %106 : vector<8x128xf32>
    %c1_49 = arith.constant 1 : index
    %c0_50 = arith.constant 0 : index
    %c0_51 = arith.constant 0 : index
    %108 = vector.load %arg2[%c1_49, %c0_50, %c0_51] : memref<8x8x128xf32, #tpu.memory_space<vmem>>, vector<1x8x128xf32>
    %109 = vector.shape_cast %108 : vector<1x8x128xf32> to vector<8x128xf32>
    %cst_52 = arith.constant 2.500000e-01 : f32
    %110 = vector.broadcast %cst_52 : f32 to vector<8x128xf32>
    %111 = arith.mulf %109, %110 : vector<8x128xf32>
    %112 = arith.subf %111, %51 : vector<8x128xf32>
    %cst_53 = arith.constant 5.000000e-01 : f32
    %113 = vector.broadcast %cst_53 : f32 to vector<8x128xf32>
    %114 = arith.addf %112, %113 : vector<8x128xf32>
    %cst_54 = arith.constant 5.000000e-01 : f32
    %115 = vector.broadcast %cst_54 : f32 to vector<8x128xf32>
    %116 = arith.mulf %114, %115 : vector<8x128xf32>
    %c2_55 = arith.constant 2 : index
    %c0_56 = arith.constant 0 : index
    %c0_57 = arith.constant 0 : index
    %117 = vector.load %arg2[%c2_55, %c0_56, %c0_57] : memref<8x8x128xf32, #tpu.memory_space<vmem>>, vector<1x8x128xf32>
    %118 = vector.shape_cast %117 : vector<1x8x128xf32> to vector<8x128xf32>
    %119 = arith.mulf %118, %82 : vector<8x128xf32>
    %120 = math.sqrt %119 : vector<8x128xf32>
    %cst_58 = arith.constant 5.000000e-01 : f32
    %121 = vector.broadcast %cst_58 : f32 to vector<8x128xf32>
    %122 = arith.mulf %120, %121 : vector<8x128xf32>
    %c3_59 = arith.constant 3 : index
    %c0_60 = arith.constant 0 : index
    %c0_61 = arith.constant 0 : index
    %123 = vector.load %arg2[%c3_59, %c0_60, %c0_61] : memref<8x8x128xf32, #tpu.memory_space<vmem>>, vector<1x8x128xf32>
    %124 = vector.shape_cast %123 : vector<1x8x128xf32> to vector<8x128xf32>
    %125 = arith.mulf %124, %84 : vector<8x128xf32>
    %126 = math.sqrt %125 : vector<8x128xf32>
    %cst_62 = arith.constant 5.000000e-01 : f32
    %127 = vector.broadcast %cst_62 : f32 to vector<8x128xf32>
    %128 = arith.mulf %126, %127 : vector<8x128xf32>
    %c4_63 = arith.constant 4 : index
    %c0_64 = arith.constant 0 : index
    %c0_65 = arith.constant 0 : index
    %129 = vector.load %arg2[%c4_63, %c0_64, %c0_65] : memref<8x8x128xf32, #tpu.memory_space<vmem>>, vector<1x8x128xf32>
    %130 = vector.shape_cast %129 : vector<1x8x128xf32> to vector<8x128xf32>
    %131 = arith.subf %107, %86 : vector<8x128xf32>
    %132 = arith.mulf %131, %131 : vector<8x128xf32>
    %133 = arith.mulf %94, %132 : vector<8x128xf32>
    %134 = arith.subf %116, %88 : vector<8x128xf32>
    %135 = arith.mulf %134, %134 : vector<8x128xf32>
    %136 = arith.mulf %94, %135 : vector<8x128xf32>
    %137 = arith.subf %122, %90 : vector<8x128xf32>
    %138 = arith.mulf %137, %137 : vector<8x128xf32>
    %139 = arith.mulf %94, %138 : vector<8x128xf32>
    %140 = arith.subf %128, %92 : vector<8x128xf32>
    %141 = arith.mulf %140, %140 : vector<8x128xf32>
    %142 = arith.mulf %94, %141 : vector<8x128xf32>
    %143 = math.log %130 : vector<8x128xf32>
    %cst_66 = arith.constant -1.000000e+02 : f32
    %144 = vector.broadcast %cst_66 : f32 to vector<8x128xf32>
    %145 = arith.maximumf %143, %144 : vector<8x128xf32>
    %cst_67 = arith.constant 1.000000e+00 : f32
    %146 = vector.broadcast %cst_67 : f32 to vector<8x128xf32>
    %147 = arith.subf %146, %130 : vector<8x128xf32>
    %148 = math.log %147 : vector<8x128xf32>
    %cst_68 = arith.constant -1.000000e+02 : f32
    %149 = vector.broadcast %cst_68 : f32 to vector<8x128xf32>
    %150 = arith.maximumf %148, %149 : vector<8x128xf32>
    %cst_69 = arith.constant 0.000000e+00 : f32
    %151 = vector.broadcast %cst_69 : f32 to vector<8x128xf32>
    %152 = arith.subf %151, %145 : vector<8x128xf32>
    %153 = arith.mulf %94, %152 : vector<8x128xf32>
    %cst_70 = arith.constant 0.000000e+00 : f32
    %154 = vector.broadcast %cst_70 : f32 to vector<8x128xf32>
    %155 = arith.subf %154, %150 : vector<8x128xf32>
    %156 = arith.mulf %96, %155 : vector<8x128xf32>
    %cst_71 = arith.constant 0.000000e+00 : f32
    %157 = vector.broadcast %cst_71 : f32 to vector<8x128xf32>
    %c5_72 = arith.constant 5 : index
    %c0_73 = arith.constant 0 : index
    %c0_74 = arith.constant 0 : index
    %158 = vector.load %arg2[%c5_72, %c0_73, %c0_74] : memref<8x8x128xf32, #tpu.memory_space<vmem>>, vector<1x8x128xf32>
    %159 = vector.shape_cast %158 : vector<1x8x128xf32> to vector<8x128xf32>
    %160 = math.log %159 : vector<8x128xf32>
    %cst_75 = arith.constant -1.000000e+02 : f32
    %161 = vector.broadcast %cst_75 : f32 to vector<8x128xf32>
    %162 = arith.maximumf %160, %161 : vector<8x128xf32>
    %cst_76 = arith.constant 1.000000e+00 : f32
    %163 = vector.broadcast %cst_76 : f32 to vector<8x128xf32>
    %164 = arith.subf %163, %159 : vector<8x128xf32>
    %165 = math.log %164 : vector<8x128xf32>
    %cst_77 = arith.constant -1.000000e+02 : f32
    %166 = vector.broadcast %cst_77 : f32 to vector<8x128xf32>
    %167 = arith.maximumf %165, %166 : vector<8x128xf32>
    %cst_78 = arith.constant 0.000000e+00 : f32
    %168 = vector.broadcast %cst_78 : f32 to vector<8x128xf32>
    %169 = arith.cmpf oeq, %98, %168 : vector<8x128xf32>
    %170 = arith.select %169, %162, %167 : vector<8x128xi1>, vector<8x128xf32>
    %171 = arith.subf %157, %170 : vector<8x128xf32>
    %c6_79 = arith.constant 6 : index
    %c0_80 = arith.constant 0 : index
    %c0_81 = arith.constant 0 : index
    %172 = vector.load %arg2[%c6_79, %c0_80, %c0_81] : memref<8x8x128xf32, #tpu.memory_space<vmem>>, vector<1x8x128xf32>
    %173 = vector.shape_cast %172 : vector<1x8x128xf32> to vector<8x128xf32>
    %174 = math.log %173 : vector<8x128xf32>
    %cst_82 = arith.constant -1.000000e+02 : f32
    %175 = vector.broadcast %cst_82 : f32 to vector<8x128xf32>
    %176 = arith.maximumf %174, %175 : vector<8x128xf32>
    %cst_83 = arith.constant 1.000000e+00 : f32
    %177 = vector.broadcast %cst_83 : f32 to vector<8x128xf32>
    %178 = arith.subf %177, %173 : vector<8x128xf32>
    %179 = math.log %178 : vector<8x128xf32>
    %cst_84 = arith.constant -1.000000e+02 : f32
    %180 = vector.broadcast %cst_84 : f32 to vector<8x128xf32>
    %181 = arith.maximumf %179, %180 : vector<8x128xf32>
    %cst_85 = arith.constant 1.000000e+00 : f32
    %182 = vector.broadcast %cst_85 : f32 to vector<8x128xf32>
    %183 = arith.cmpf oeq, %98, %182 : vector<8x128xf32>
    %184 = arith.select %183, %176, %181 : vector<8x128xi1>, vector<8x128xf32>
    %185 = arith.subf %171, %184 : vector<8x128xf32>
    %c7 = arith.constant 7 : index
    %c0_86 = arith.constant 0 : index
    %c0_87 = arith.constant 0 : index
    %186 = vector.load %arg2[%c7, %c0_86, %c0_87] : memref<8x8x128xf32, #tpu.memory_space<vmem>>, vector<1x8x128xf32>
    %187 = vector.shape_cast %186 : vector<1x8x128xf32> to vector<8x128xf32>
    %188 = math.log %187 : vector<8x128xf32>
    %cst_88 = arith.constant -1.000000e+02 : f32
    %189 = vector.broadcast %cst_88 : f32 to vector<8x128xf32>
    %190 = arith.maximumf %188, %189 : vector<8x128xf32>
    %cst_89 = arith.constant 1.000000e+00 : f32
    %191 = vector.broadcast %cst_89 : f32 to vector<8x128xf32>
    %192 = arith.subf %191, %187 : vector<8x128xf32>
    %193 = math.log %192 : vector<8x128xf32>
    %cst_90 = arith.constant -1.000000e+02 : f32
    %194 = vector.broadcast %cst_90 : f32 to vector<8x128xf32>
    %195 = arith.maximumf %193, %194 : vector<8x128xf32>
    %cst_91 = arith.constant 2.000000e+00 : f32
    %196 = vector.broadcast %cst_91 : f32 to vector<8x128xf32>
    %197 = arith.cmpf oeq, %98, %196 : vector<8x128xf32>
    %198 = arith.select %197, %190, %195 : vector<8x128xi1>, vector<8x128xf32>
    %199 = arith.subf %185, %198 : vector<8x128xf32>
    %200 = arith.mulf %94, %199 : vector<8x128xf32>
    %c0_92 = arith.constant 0 : index
    %c0_93 = arith.constant 0 : index
    %c0_94 = arith.constant 0 : index
    %c0_95 = arith.constant 0 : index
    %201 = vector.load %arg4[%c0_92, %c0_93, %c0_94, %c0_95] : memref<1x9x8x128xf32, #tpu.memory_space<vmem>>, vector<1x1x8x128xf32>
    %202 = vector.shape_cast %201 : vector<1x1x8x128xf32> to vector<8x128xf32>
    %203 = vector.shape_cast %133 : vector<8x128xf32> to vector<1x8x128xf32>
    %cst_96 = arith.constant dense<0.000000e+00> : vector<8x128xf32>
    %204 = vector.multi_reduction <add>, %203, %cst_96 [0] : vector<1x8x128xf32> to vector<8x128xf32>
    %205 = arith.addf %202, %204 : vector<8x128xf32>
    %c0_97 = arith.constant 0 : index
    %c0_98 = arith.constant 0 : index
    %c0_99 = arith.constant 0 : index
    %c0_100 = arith.constant 0 : index
    %206 = vector.load %arg4[%c0_97, %c0_98, %c0_99, %c0_100] : memref<1x9x8x128xf32, #tpu.memory_space<vmem>>, vector<1x1x8x128xf32>
    %207 = vector.shape_cast %206 : vector<1x1x8x128xf32> to vector<8x128xf32>
    %208 = vector.shape_cast %205 : vector<8x128xf32> to vector<1x1x8x128xf32>
    tpu.vector_store %arg4[%c0_97, %c0_98, %c0_99, %c0_100], %208 {strides = array<i32>} : memref<1x9x8x128xf32, #tpu.memory_space<vmem>>, vector<1x1x8x128xf32>,
    %c0_101 = arith.constant 0 : index
    %c1_102 = arith.constant 1 : index
    %c0_103 = arith.constant 0 : index
    %c0_104 = arith.constant 0 : index
    %209 = vector.load %arg4[%c0_101, %c1_102, %c0_103, %c0_104] : memref<1x9x8x128xf32, #tpu.memory_space<vmem>>, vector<1x1x8x128xf32>
    %210 = vector.shape_cast %209 : vector<1x1x8x128xf32> to vector<8x128xf32>
    %211 = vector.shape_cast %136 : vector<8x128xf32> to vector<1x8x128xf32>
    %cst_105 = arith.constant dense<0.000000e+00> : vector<8x128xf32>
    %212 = vector.multi_reduction <add>, %211, %cst_105 [0] : vector<1x8x128xf32> to vector<8x128xf32>
    %213 = arith.addf %210, %212 : vector<8x128xf32>
    %c0_106 = arith.constant 0 : index
    %c1_107 = arith.constant 1 : index
    %c0_108 = arith.constant 0 : index
    %c0_109 = arith.constant 0 : index
    %214 = vector.load %arg4[%c0_106, %c1_107, %c0_108, %c0_109] : memref<1x9x8x128xf32, #tpu.memory_space<vmem>>, vector<1x1x8x128xf32>
    %215 = vector.shape_cast %214 : vector<1x1x8x128xf32> to vector<8x128xf32>
    %216 = vector.shape_cast %213 : vector<8x128xf32> to vector<1x1x8x128xf32>
    tpu.vector_store %arg4[%c0_106, %c1_107, %c0_108, %c0_109], %216 {strides = array<i32>} : memref<1x9x8x128xf32, #tpu.memory_space<vmem>>, vector<1x1x8x128xf32>,
    %c0_110 = arith.constant 0 : index
    %c2_111 = arith.constant 2 : index
    %c0_112 = arith.constant 0 : index
    %c0_113 = arith.constant 0 : index
    %217 = vector.load %arg4[%c0_110, %c2_111, %c0_112, %c0_113] : memref<1x9x8x128xf32, #tpu.memory_space<vmem>>, vector<1x1x8x128xf32>
    %218 = vector.shape_cast %217 : vector<1x1x8x128xf32> to vector<8x128xf32>
    %219 = vector.shape_cast %139 : vector<8x128xf32> to vector<1x8x128xf32>
    %cst_114 = arith.constant dense<0.000000e+00> : vector<8x128xf32>
    %220 = vector.multi_reduction <add>, %219, %cst_114 [0] : vector<1x8x128xf32> to vector<8x128xf32>
    %221 = arith.addf %218, %220 : vector<8x128xf32>
    %c0_115 = arith.constant 0 : index
    %c2_116 = arith.constant 2 : index
    %c0_117 = arith.constant 0 : index
    %c0_118 = arith.constant 0 : index
    %222 = vector.load %arg4[%c0_115, %c2_116, %c0_117, %c0_118] : memref<1x9x8x128xf32, #tpu.memory_space<vmem>>, vector<1x1x8x128xf32>
    %223 = vector.shape_cast %222 : vector<1x1x8x128xf32> to vector<8x128xf32>
    %224 = vector.shape_cast %221 : vector<8x128xf32> to vector<1x1x8x128xf32>
    tpu.vector_store %arg4[%c0_115, %c2_116, %c0_117, %c0_118], %224 {strides = array<i32>} : memref<1x9x8x128xf32, #tpu.memory_space<vmem>>, vector<1x1x8x128xf32>,
    %c0_119 = arith.constant 0 : index
    %c3_120 = arith.constant 3 : index
    %c0_121 = arith.constant 0 : index
    %c0_122 = arith.constant 0 : index
    %225 = vector.load %arg4[%c0_119, %c3_120, %c0_121, %c0_122] : memref<1x9x8x128xf32, #tpu.memory_space<vmem>>, vector<1x1x8x128xf32>
    %226 = vector.shape_cast %225 : vector<1x1x8x128xf32> to vector<8x128xf32>
    %227 = vector.shape_cast %142 : vector<8x128xf32> to vector<1x8x128xf32>
    %cst_123 = arith.constant dense<0.000000e+00> : vector<8x128xf32>
    %228 = vector.multi_reduction <add>, %227, %cst_123 [0] : vector<1x8x128xf32> to vector<8x128xf32>
    %229 = arith.addf %226, %228 : vector<8x128xf32>
    %c0_124 = arith.constant 0 : index
    %c3_125 = arith.constant 3 : index
    %c0_126 = arith.constant 0 : index
    %c0_127 = arith.constant 0 : index
    %230 = vector.load %arg4[%c0_124, %c3_125, %c0_126, %c0_127] : memref<1x9x8x128xf32, #tpu.memory_space<vmem>>, vector<1x1x8x128xf32>
    %231 = vector.shape_cast %230 : vector<1x1x8x128xf32> to vector<8x128xf32>
    %232 = vector.shape_cast %229 : vector<8x128xf32> to vector<1x1x8x128xf32>
    tpu.vector_store %arg4[%c0_124, %c3_125, %c0_126, %c0_127], %232 {strides = array<i32>} : memref<1x9x8x128xf32, #tpu.memory_space<vmem>>, vector<1x1x8x128xf32>,
    %c0_128 = arith.constant 0 : index
    %c4_129 = arith.constant 4 : index
    %c0_130 = arith.constant 0 : index
    %c0_131 = arith.constant 0 : index
    %233 = vector.load %arg4[%c0_128, %c4_129, %c0_130, %c0_131] : memref<1x9x8x128xf32, #tpu.memory_space<vmem>>, vector<1x1x8x128xf32>
    %234 = vector.shape_cast %233 : vector<1x1x8x128xf32> to vector<8x128xf32>
    %235 = vector.shape_cast %153 : vector<8x128xf32> to vector<1x8x128xf32>
    %cst_132 = arith.constant dense<0.000000e+00> : vector<8x128xf32>
    %236 = vector.multi_reduction <add>, %235, %cst_132 [0] : vector<1x8x128xf32> to vector<8x128xf32>
    %237 = arith.addf %234, %236 : vector<8x128xf32>
    %c0_133 = arith.constant 0 : index
    %c4_134 = arith.constant 4 : index
    %c0_135 = arith.constant 0 : index
    %c0_136 = arith.constant 0 : index
    %238 = vector.load %arg4[%c0_133, %c4_134, %c0_135, %c0_136] : memref<1x9x8x128xf32, #tpu.memory_space<vmem>>, vector<1x1x8x128xf32>
    %239 = vector.shape_cast %238 : vector<1x1x8x128xf32> to vector<8x128xf32>
    %240 = vector.shape_cast %237 : vector<8x128xf32> to vector<1x1x8x128xf32>
    tpu.vector_store %arg4[%c0_133, %c4_134, %c0_135, %c0_136], %240 {strides = array<i32>} : memref<1x9x8x128xf32, #tpu.memory_space<vmem>>, vector<1x1x8x128xf32>,
    %c0_137 = arith.constant 0 : index
    %c5_138 = arith.constant 5 : index
    %c0_139 = arith.constant 0 : index
    %c0_140 = arith.constant 0 : index
    %241 = vector.load %arg4[%c0_137, %c5_138, %c0_139, %c0_140] : memref<1x9x8x128xf32, #tpu.memory_space<vmem>>, vector<1x1x8x128xf32>
    %242 = vector.shape_cast %241 : vector<1x1x8x128xf32> to vector<8x128xf32>
    %243 = vector.shape_cast %156 : vector<8x128xf32> to vector<1x8x128xf32>
    %cst_141 = arith.constant dense<0.000000e+00> : vector<8x128xf32>
    %244 = vector.multi_reduction <add>, %243, %cst_141 [0] : vector<1x8x128xf32> to vector<8x128xf32>
    %245 = arith.addf %242, %244 : vector<8x128xf32>
    %c0_142 = arith.constant 0 : index
    %c5_143 = arith.constant 5 : index
    %c0_144 = arith.constant 0 : index
    %c0_145 = arith.constant 0 : index
    %246 = vector.load %arg4[%c0_142, %c5_143, %c0_144, %c0_145] : memref<1x9x8x128xf32, #tpu.memory_space<vmem>>, vector<1x1x8x128xf32>
    %247 = vector.shape_cast %246 : vector<1x1x8x128xf32> to vector<8x128xf32>
    %248 = vector.shape_cast %245 : vector<8x128xf32> to vector<1x1x8x128xf32>
    tpu.vector_store %arg4[%c0_142, %c5_143, %c0_144, %c0_145], %248 {strides = array<i32>} : memref<1x9x8x128xf32, #tpu.memory_space<vmem>>, vector<1x1x8x128xf32>,
    %c0_146 = arith.constant 0 : index
    %c6_147 = arith.constant 6 : index
    %c0_148 = arith.constant 0 : index
    %c0_149 = arith.constant 0 : index
    %249 = vector.load %arg4[%c0_146, %c6_147, %c0_148, %c0_149] : memref<1x9x8x128xf32, #tpu.memory_space<vmem>>, vector<1x1x8x128xf32>
    %250 = vector.shape_cast %249 : vector<1x1x8x128xf32> to vector<8x128xf32>
    %251 = vector.shape_cast %200 : vector<8x128xf32> to vector<1x8x128xf32>
    %cst_150 = arith.constant dense<0.000000e+00> : vector<8x128xf32>
    %252 = vector.multi_reduction <add>, %251, %cst_150 [0] : vector<1x8x128xf32> to vector<8x128xf32>
    %253 = arith.addf %250, %252 : vector<8x128xf32>
    %c0_151 = arith.constant 0 : index
    %c6_152 = arith.constant 6 : index
    %c0_153 = arith.constant 0 : index
    %c0_154 = arith.constant 0 : index
    %254 = vector.load %arg4[%c0_151, %c6_152, %c0_153, %c0_154] : memref<1x9x8x128xf32, #tpu.memory_space<vmem>>, vector<1x1x8x128xf32>
    %255 = vector.shape_cast %254 : vector<1x1x8x128xf32> to vector<8x128xf32>
    %256 = vector.shape_cast %253 : vector<8x128xf32> to vector<1x1x8x128xf32>
    tpu.vector_store %arg4[%c0_151, %c6_152, %c0_153, %c0_154], %256 {strides = array<i32>} : memref<1x9x8x128xf32, #tpu.memory_space<vmem>>, vector<1x1x8x128xf32>,
    %c0_155 = arith.constant 0 : index
    %c7_156 = arith.constant 7 : index
    %c0_157 = arith.constant 0 : index
    %c0_158 = arith.constant 0 : index
    %257 = vector.load %arg4[%c0_155, %c7_156, %c0_157, %c0_158] : memref<1x9x8x128xf32, #tpu.memory_space<vmem>>, vector<1x1x8x128xf32>
    %258 = vector.shape_cast %257 : vector<1x1x8x128xf32> to vector<8x128xf32>
    %259 = vector.shape_cast %94 : vector<8x128xf32> to vector<1x8x128xf32>
    %cst_159 = arith.constant dense<0.000000e+00> : vector<8x128xf32>
    %260 = vector.multi_reduction <add>, %259, %cst_159 [0] : vector<1x8x128xf32> to vector<8x128xf32>
    %261 = arith.addf %258, %260 : vector<8x128xf32>
    %c0_160 = arith.constant 0 : index
    %c7_161 = arith.constant 7 : index
    %c0_162 = arith.constant 0 : index
    %c0_163 = arith.constant 0 : index
    %262 = vector.load %arg4[%c0_160, %c7_161, %c0_162, %c0_163] : memref<1x9x8x128xf32, #tpu.memory_space<vmem>>, vector<1x1x8x128xf32>
    %263 = vector.shape_cast %262 : vector<1x1x8x128xf32> to vector<8x128xf32>
    %264 = vector.shape_cast %261 : vector<8x128xf32> to vector<1x1x8x128xf32>
    tpu.vector_store %arg4[%c0_160, %c7_161, %c0_162, %c0_163], %264 {strides = array<i32>} : memref<1x9x8x128xf32, #tpu.memory_space<vmem>>, vector<1x1x8x128xf32>,
    %c0_164 = arith.constant 0 : index
    %c8 = arith.constant 8 : index
    %c0_165 = arith.constant 0 : index
    %c0_166 = arith.constant 0 : index
    %265 = vector.load %arg4[%c0_164, %c8, %c0_165, %c0_166] : memref<1x9x8x128xf32, #tpu.memory_space<vmem>>, vector<1x1x8x128xf32>
    %266 = vector.shape_cast %265 : vector<1x1x8x128xf32> to vector<8x128xf32>
    %267 = vector.shape_cast %96 : vector<8x128xf32> to vector<1x8x128xf32>
    %cst_167 = arith.constant dense<0.000000e+00> : vector<8x128xf32>
    %268 = vector.multi_reduction <add>, %267, %cst_167 [0] : vector<1x8x128xf32> to vector<8x128xf32>
    %269 = arith.addf %266, %268 : vector<8x128xf32>
    %c0_168 = arith.constant 0 : index
    %c8_169 = arith.constant 8 : index
    %c0_170 = arith.constant 0 : index
    %c0_171 = arith.constant 0 : index
    %270 = vector.load %arg4[%c0_168, %c8_169, %c0_170, %c0_171] : memref<1x9x8x128xf32, #tpu.memory_space<vmem>>, vector<1x1x8x128xf32>
    %271 = vector.shape_cast %270 : vector<1x1x8x128xf32> to vector<8x128xf32>
    %272 = vector.shape_cast %269 : vector<8x128xf32> to vector<1x1x8x128xf32>
    tpu.vector_store %arg4[%c0_168, %c8_169, %c0_170, %c0_171], %272 {strides = array<i32>} : memref<1x9x8x128xf32, #tpu.memory_space<vmem>>, vector<1x1x8x128xf32>,
    return
  }
  func.func @transform_0(%arg0: i32, %arg1: i32) -> (i32, i32, i32) {
    %c1_i32 = arith.constant 1 : i32
    %0 = arith.muli %arg0, %c1_i32 : i32
    %1 = arith.addi %0, %arg1 : i32
    %c0_i32 = arith.constant 0 : i32
    %c0_i32_0 = arith.constant 0 : i32
    %c0_i32_1 = arith.constant 0 : i32
    return %c0_i32, %1, %c0_i32_0 : i32, i32, i32
  }
  func.func @transform_1(%arg0: i32, %arg1: i32) -> (i32, i32, i32) {
    %c1_i32 = arith.constant 1 : i32
    %0 = arith.muli %arg0, %c1_i32 : i32
    %1 = arith.addi %0, %arg1 : i32
    %c0_i32 = arith.constant 0 : i32
    %c0_i32_0 = arith.constant 0 : i32
    %c0_i32_1 = arith.constant 0 : i32
    return %c0_i32, %1, %c0_i32_0 : i32, i32, i32
  }
  func.func @transform_2(%arg0: i32, %arg1: i32) -> (i32, i32, i32, i32) {
    %c0_i32 = arith.constant 0 : i32
    %c0_i32_0 = arith.constant 0 : i32
    %c0_i32_1 = arith.constant 0 : i32
    %c0_i32_2 = arith.constant 0 : i32
    return %arg0, %c0_i32, %c0_i32_0, %c0_i32_1 : i32, i32, i32, i32
  }
}

module attributes {stable_mosaic.version = 11 : i64} {
  func.func @kernel(%arg0: i32, %arg1: i32, %arg2: memref<8x8x128xf32, #tpu.memory_space<vmem>>, %arg3: memref<7x8x128xf32, #tpu.memory_space<vmem>>, %arg4: memref<1x9x8x128xf32, #tpu.memory_space<vmem>>) attributes {dimension_semantics = [#tpu.dimension_semantics<parallel>, #tpu.dimension_semantics<arbitrary>], iteration_bounds = array<i64: 2, 1>, scalar_prefetch = 0 : i64, scratch_operands = 0 : i64, tpu.core_type = #tpu.core_type<tc>, window_params = [{transform_indices = @transform_0, window_bounds = array<i64: 8, 8, 128>}, {transform_indices = @transform_1, window_bounds = array<i64: 7, 8, 128>}, {transform_indices = @transform_2, window_bounds = array<i64: 1, 9, 8, 128>}]} {
    %c0_i32 = arith.constant 0 : i32
    %0 = arith.cmpi eq, %arg1, %c0_i32 : i32
    %1 = arith.extui %0 : i1 to i32
    %c0_i32_0 = arith.constant 0 : i32
    %2 = arith.cmpi ne, %1, %c0_i32_0 : i32
    scf.if %2 {
      %cst_172 = arith.constant 0.000000e+00 : f32
      %273 = vector.broadcast %cst_172 : f32 to vector<1x9x8x128xf32>
      %c0_173 = arith.constant 0 : index
      %c0_174 = arith.constant 0 : index
      %c0_175 = arith.constant 0 : index
      %c0_176 = arith.constant 0 : index
      %274 = vector.load %arg4[%c0_173, %c0_174, %c0_175, %c0_176] : memref<1x9x8x128xf32, #tpu.memory_space<vmem>>, vector<1x9x8x128xf32>
      tpu.vector_store %arg4[%c0_173, %c0_174, %c0_175, %c0_176], %273 {strides = array<i32>} : memref<1x9x8x128xf32, #tpu.memory_space<vmem>>, vector<1x9x8x128xf32>,
    } else {
    }
    %c1_i32 = arith.constant 1 : i32
    %3 = arith.muli %arg0, %c1_i32 : i32
    %4 = arith.addi %3, %arg1 : i32
    %c1024_i32 = arith.constant 1024 : i32
    %5 = arith.muli %4, %c1024_i32 : i32
    %6 = tpu.iota {dimensions = array<i32: 0>} : vector<8x128xi32>
    %7 = tpu.iota {dimensions = array<i32: 1>} : vector<8x128xi32>
    %c128_i32 = arith.constant 128 : i32
    %8 = vector.broadcast %c128_i32 : i32 to vector<8x128xi32>
    %9 = arith.muli %6, %8 : vector<8x128xi32>
    %10 = vector.broadcast %5 : i32 to vector<8x128xi32>
    %11 = arith.addi %10, %9 : vector<8x128xi32>
    %12 = arith.addi %11, %7 : vector<8x128xi32>
    %13 = arith.sitofp %12 : vector<8x128xi32> to vector<8x128xf32>
    %cst = arith.constant 2.500000e-01 : f32
    %14 = vector.broadcast %cst : f32 to vector<8x128xf32>
    %15 = arith.mulf %13, %14 : vector<8x128xf32>
    %16 = math.floor %15 : vector<8x128xf32>
    %cst_1 = arith.constant 4.000000e+00 : f32
    %17 = vector.broadcast %cst_1 : f32 to vector<8x128xf32>
    %18 = arith.mulf %16, %17 : vector<8x128xf32>
    %19 = arith.subf %13, %18 : vector<8x128xf32>
    %cst_2 = arith.constant 0.000000e+00 : f32
    %20 = vector.broadcast %cst_2 : f32 to vector<8x128xf32>
    %21 = arith.cmpf olt, %19, %20 : vector<8x128xf32>
    %cst_3 = arith.constant 1.000000e+00 : f32
    %22 = vector.broadcast %cst_3 : f32 to vector<8x128xf32>
    %23 = arith.subf %16, %22 : vector<8x128xf32>
    %24 = arith.select %21, %23, %16 : vector<8x128xi1>, vector<8x128xf32>
    %cst_4 = arith.constant 4.000000e+00 : f32
    %25 = vector.broadcast %cst_4 : f32 to vector<8x128xf32>
    %26 = arith.cmpf oge, %19, %25 : vector<8x128xf32>
    %cst_5 = arith.constant 1.000000e+00 : f32
    %27 = vector.broadcast %cst_5 : f32 to vector<8x128xf32>
    %28 = arith.addf %24, %27 : vector<8x128xf32>
    %29 = arith.select %26, %28, %24 : vector<8x128xi1>, vector<8x128xf32>
    %cst_6 = arith.constant 4.000000e+00 : f32
    %30 = vector.broadcast %cst_6 : f32 to vector<8x128xf32>
    %31 = arith.mulf %29, %30 : vector<8x128xf32>
    %32 = arith.subf %13, %31 : vector<8x128xf32>
    %cst_7 = arith.constant 2.500000e-01 : f32
    %33 = vector.broadcast %cst_7 : f32 to vector<8x128xf32>
    %34 = arith.mulf %29, %33 : vector<8x128xf32>
    %35 = math.floor %34 : vector<8x128xf32>
    %cst_8 = arith.constant 4.000000e+00 : f32
    %36 = vector.broadcast %cst_8 : f32 to vector<8x128xf32>
    %37 = arith.mulf %35, %36 : vector<8x128xf32>
    %38 = arith.subf %29, %37 : vector<8x128xf32>
    %cst_9 = arith.constant 0.000000e+00 : f32
    %39 = vector.broadcast %cst_9 : f32 to vector<8x128xf32>
    %40 = arith.cmpf olt, %38, %39 : vector<8x128xf32>
    %cst_10 = arith.constant 1.000000e+00 : f32
    %41 = vector.broadcast %cst_10 : f32 to vector<8x128xf32>
    %42 = arith.subf %35, %41 : vector<8x128xf32>
    %43 = arith.select %40, %42, %35 : vector<8x128xi1>, vector<8x128xf32>
    %cst_11 = arith.constant 4.000000e+00 : f32
    %44 = vector.broadcast %cst_11 : f32 to vector<8x128xf32>
    %45 = arith.cmpf oge, %38, %44 : vector<8x128xf32>
    %cst_12 = arith.constant 1.000000e+00 : f32
    %46 = vector.broadcast %cst_12 : f32 to vector<8x128xf32>
    %47 = arith.addf %43, %46 : vector<8x128xf32>
    %48 = arith.select %45, %47, %43 : vector<8x128xi1>, vector<8x128xf32>
    %cst_13 = arith.constant 4.000000e+00 : f32
    %49 = vector.broadcast %cst_13 : f32 to vector<8x128xf32>
    %50 = arith.mulf %48, %49 : vector<8x128xf32>
    %51 = arith.subf %29, %50 : vector<8x128xf32>
    %cst_14 = arith.constant 0.333333343 : f32
    %52 = vector.broadcast %cst_14 : f32 to vector<8x128xf32>
    %53 = arith.mulf %48, %52 : vector<8x128xf32>
    %54 = math.floor %53 : vector<8x128xf32>
    %cst_15 = arith.constant 3.000000e+00 : f32
    %55 = vector.broadcast %cst_15 : f32 to vector<8x128xf32>
    %56 = arith.mulf %54, %55 : vector<8x128xf32>
    %57 = arith.subf %48, %56 : vector<8x128xf32>
    %cst_16 = arith.constant 0.000000e+00 : f32
    %58 = vector.broadcast %cst_16 : f32 to vector<8x128xf32>
    %59 = arith.cmpf olt, %57, %58 : vector<8x128xf32>
    %cst_17 = arith.constant 1.000000e+00 : f32
    %60 = vector.broadcast %cst_17 : f32 to vector<8x128xf32>
    %61 = arith.subf %54, %60 : vector<8x128xf32>
    %62 = arith.select %59, %61, %54 : vector<8x128xi1>, vector<8x128xf32>
    %cst_18 = arith.constant 3.000000e+00 : f32
    %63 = vector.broadcast %cst_18 : f32 to vector<8x128xf32>
    %64 = arith.cmpf oge, %57, %63 : vector<8x128xf32>
    %cst_19 = arith.constant 1.000000e+00 : f32
    %65 = vector.broadcast %cst_19 : f32 to vector<8x128xf32>
    %66 = arith.addf %62, %65 : vector<8x128xf32>
    %67 = arith.select %64, %66, %62 : vector<8x128xi1>, vector<8x128xf32>
    %cst_20 = arith.constant 3.000000e+00 : f32
    %68 = vector.broadcast %cst_20 : f32 to vector<8x128xf32>
    %69 = arith.mulf %67, %68 : vector<8x128xf32>
    %70 = arith.subf %48, %69 : vector<8x128xf32>
    %cst_21 = arith.constant 0.00290697673 : f32
    %71 = vector.broadcast %cst_21 : f32 to vector<8x128xf32>
    %cst_22 = arith.constant 0.00313479616 : f32
    %72 = vector.broadcast %cst_22 : f32 to vector<8x128xf32>
    %cst_23 = arith.constant 0.000000e+00 : f32
    %73 = vector.broadcast %cst_23 : f32 to vector<8x128xf32>
    %74 = arith.cmpf oeq, %70, %73 : vector<8x128xf32>
    %cst_24 = arith.constant 0.0123456791 : f32
    %75 = vector.broadcast %cst_24 : f32 to vector<8x128xf32>
    %76 = arith.select %74, %75, %71 : vector<8x128xi1>, vector<8x128xf32>
    %cst_25 = arith.constant 0.0121951215 : f32
    %77 = vector.broadcast %cst_25 : f32 to vector<8x128xf32>
    %78 = arith.select %74, %77, %72 : vector<8x128xi1>, vector<8x128xf32>
    %cst_26 = arith.constant 1.000000e+00 : f32
    %79 = vector.broadcast %cst_26 : f32 to vector<8x128xf32>
    %80 = arith.cmpf oeq, %70, %79 : vector<8x128xf32>
    %cst_27 = arith.constant 0.00740740728 : f32
    %81 = vector.broadcast %cst_27 : f32 to vector<8x128xf32>
    %82 = arith.select %80, %81, %76 : vector<8x128xi1>, vector<8x128xf32>
    %cst_28 = arith.constant 5.917160e-03 : f32
    %83 = vector.broadcast %cst_28 : f32 to vector<8x128xf32>
    %84 = arith.select %80, %83, %78 : vector<8x128xi1>, vector<8x128xf32>
    %c0 = arith.constant 0 : index
    %c0_29 = arith.constant 0 : index
    %c0_30 = arith.constant 0 : index
    %85 = vector.load %arg3[%c0, %c0_29, %c0_30] : memref<7x8x128xf32, #tpu.memory_space<vmem>>, vector<1x8x128xf32>
    %86 = vector.shape_cast %85 : vector<1x8x128xf32> to vector<8x128xf32>
    %c1 = arith.constant 1 : index
    %c0_31 = arith.constant 0 : index
    %c0_32 = arith.constant 0 : index
    %87 = vector.load %arg3[%c1, %c0_31, %c0_32] : memref<7x8x128xf32, #tpu.memory_space<vmem>>, vector<1x8x128xf32>
    %88 = vector.shape_cast %87 : vector<1x8x128xf32> to vector<8x128xf32>
    %c2 = arith.constant 2 : index
    %c0_33 = arith.constant 0 : index
    %c0_34 = arith.constant 0 : index
    %89 = vector.load %arg3[%c2, %c0_33, %c0_34] : memref<7x8x128xf32, #tpu.memory_space<vmem>>, vector<1x8x128xf32>
    %90 = vector.shape_cast %89 : vector<1x8x128xf32> to vector<8x128xf32>
    %c3 = arith.constant 3 : index
    %c0_35 = arith.constant 0 : index
    %c0_36 = arith.constant 0 : index
    %91 = vector.load %arg3[%c3, %c0_35, %c0_36] : memref<7x8x128xf32, #tpu.memory_space<vmem>>, vector<1x8x128xf32>
    %92 = vector.shape_cast %91 : vector<1x8x128xf32> to vector<8x128xf32>
    %c4 = arith.constant 4 : index
    %c0_37 = arith.constant 0 : index
    %c0_38 = arith.constant 0 : index
    %93 = vector.load %arg3[%c4, %c0_37, %c0_38] : memref<7x8x128xf32, #tpu.memory_space<vmem>>, vector<1x8x128xf32>
    %94 = vector.shape_cast %93 : vector<1x8x128xf32> to vector<8x128xf32>
    %c5 = arith.constant 5 : index
    %c0_39 = arith.constant 0 : index
    %c0_40 = arith.constant 0 : index
    %95 = vector.load %arg3[%c5, %c0_39, %c0_40] : memref<7x8x128xf32, #tpu.memory_space<vmem>>, vector<1x8x128xf32>
    %96 = vector.shape_cast %95 : vector<1x8x128xf32> to vector<8x128xf32>
    %c6 = arith.constant 6 : index
    %c0_41 = arith.constant 0 : index
    %c0_42 = arith.constant 0 : index
    %97 = vector.load %arg3[%c6, %c0_41, %c0_42] : memref<7x8x128xf32, #tpu.memory_space<vmem>>, vector<1x8x128xf32>
    %98 = vector.shape_cast %97 : vector<1x8x128xf32> to vector<8x128xf32>
    %c0_43 = arith.constant 0 : index
    %c0_44 = arith.constant 0 : index
    %c0_45 = arith.constant 0 : index
    %99 = vector.load %arg2[%c0_43, %c0_44, %c0_45] : memref<8x8x128xf32, #tpu.memory_space<vmem>>, vector<1x8x128xf32>
    %100 = vector.shape_cast %99 : vector<1x8x128xf32> to vector<8x128xf32>
    %cst_46 = arith.constant 1.250000e-01 : f32
    %101 = vector.broadcast %cst_46 : f32 to vector<8x128xf32>
    %102 = arith.mulf %100, %101 : vector<8x128xf32>
    %103 = arith.subf %102, %32 : vector<8x128xf32>
    %cst_47 = arith.constant 5.000000e-01 : f32
    %104 = vector.broadcast %cst_47 : f32 to vector<8x128xf32>
    %105 = arith.addf %103, %104 : vector<8x128xf32>
    %cst_48 = arith.constant 5.000000e-01 : f32
    %106 = vector.broadcast %cst_48 : f32 to vector<8x128xf32>
    %107 = arith.mulf %105, %106 : vector<8x128xf32>
    %c1_49 = arith.constant 1 : index
    %c0_50 = arith.constant 0 : index
    %c0_51 = arith.constant 0 : index
    %108 = vector.load %arg2[%c1_49, %c0_50, %c0_51] : memref<8x8x128xf32, #tpu.memory_space<vmem>>, vector<1x8x128xf32>
    %109 = vector.shape_cast %108 : vector<1x8x128xf32> to vector<8x128xf32>
    %cst_52 = arith.constant 1.250000e-01 : f32
    %110 = vector.broadcast %cst_52 : f32 to vector<8x128xf32>
    %111 = arith.mulf %109, %110 : vector<8x128xf32>
    %112 = arith.subf %111, %51 : vector<8x128xf32>
    %cst_53 = arith.constant 5.000000e-01 : f32
    %113 = vector.broadcast %cst_53 : f32 to vector<8x128xf32>
    %114 = arith.addf %112, %113 : vector<8x128xf32>
    %cst_54 = arith.constant 5.000000e-01 : f32
    %115 = vector.broadcast %cst_54 : f32 to vector<8x128xf32>
    %116 = arith.mulf %114, %115 : vector<8x128xf32>
    %c2_55 = arith.constant 2 : index
    %c0_56 = arith.constant 0 : index
    %c0_57 = arith.constant 0 : index
    %117 = vector.load %arg2[%c2_55, %c0_56, %c0_57] : memref<8x8x128xf32, #tpu.memory_space<vmem>>, vector<1x8x128xf32>
    %118 = vector.shape_cast %117 : vector<1x8x128xf32> to vector<8x128xf32>
    %119 = arith.mulf %118, %82 : vector<8x128xf32>
    %120 = math.sqrt %119 : vector<8x128xf32>
    %cst_58 = arith.constant 5.000000e-01 : f32
    %121 = vector.broadcast %cst_58 : f32 to vector<8x128xf32>
    %122 = arith.mulf %120, %121 : vector<8x128xf32>
    %c3_59 = arith.constant 3 : index
    %c0_60 = arith.constant 0 : index
    %c0_61 = arith.constant 0 : index
    %123 = vector.load %arg2[%c3_59, %c0_60, %c0_61] : memref<8x8x128xf32, #tpu.memory_space<vmem>>, vector<1x8x128xf32>
    %124 = vector.shape_cast %123 : vector<1x8x128xf32> to vector<8x128xf32>
    %125 = arith.mulf %124, %84 : vector<8x128xf32>
    %126 = math.sqrt %125 : vector<8x128xf32>
    %cst_62 = arith.constant 5.000000e-01 : f32
    %127 = vector.broadcast %cst_62 : f32 to vector<8x128xf32>
    %128 = arith.mulf %126, %127 : vector<8x128xf32>
    %c4_63 = arith.constant 4 : index
    %c0_64 = arith.constant 0 : index
    %c0_65 = arith.constant 0 : index
    %129 = vector.load %arg2[%c4_63, %c0_64, %c0_65] : memref<8x8x128xf32, #tpu.memory_space<vmem>>, vector<1x8x128xf32>
    %130 = vector.shape_cast %129 : vector<1x8x128xf32> to vector<8x128xf32>
    %131 = arith.subf %107, %86 : vector<8x128xf32>
    %132 = arith.mulf %131, %131 : vector<8x128xf32>
    %133 = arith.mulf %94, %132 : vector<8x128xf32>
    %134 = arith.subf %116, %88 : vector<8x128xf32>
    %135 = arith.mulf %134, %134 : vector<8x128xf32>
    %136 = arith.mulf %94, %135 : vector<8x128xf32>
    %137 = arith.subf %122, %90 : vector<8x128xf32>
    %138 = arith.mulf %137, %137 : vector<8x128xf32>
    %139 = arith.mulf %94, %138 : vector<8x128xf32>
    %140 = arith.subf %128, %92 : vector<8x128xf32>
    %141 = arith.mulf %140, %140 : vector<8x128xf32>
    %142 = arith.mulf %94, %141 : vector<8x128xf32>
    %143 = math.log %130 : vector<8x128xf32>
    %cst_66 = arith.constant -1.000000e+02 : f32
    %144 = vector.broadcast %cst_66 : f32 to vector<8x128xf32>
    %145 = arith.maximumf %143, %144 : vector<8x128xf32>
    %cst_67 = arith.constant 1.000000e+00 : f32
    %146 = vector.broadcast %cst_67 : f32 to vector<8x128xf32>
    %147 = arith.subf %146, %130 : vector<8x128xf32>
    %148 = math.log %147 : vector<8x128xf32>
    %cst_68 = arith.constant -1.000000e+02 : f32
    %149 = vector.broadcast %cst_68 : f32 to vector<8x128xf32>
    %150 = arith.maximumf %148, %149 : vector<8x128xf32>
    %cst_69 = arith.constant 0.000000e+00 : f32
    %151 = vector.broadcast %cst_69 : f32 to vector<8x128xf32>
    %152 = arith.subf %151, %145 : vector<8x128xf32>
    %153 = arith.mulf %94, %152 : vector<8x128xf32>
    %cst_70 = arith.constant 0.000000e+00 : f32
    %154 = vector.broadcast %cst_70 : f32 to vector<8x128xf32>
    %155 = arith.subf %154, %150 : vector<8x128xf32>
    %156 = arith.mulf %96, %155 : vector<8x128xf32>
    %cst_71 = arith.constant 0.000000e+00 : f32
    %157 = vector.broadcast %cst_71 : f32 to vector<8x128xf32>
    %c5_72 = arith.constant 5 : index
    %c0_73 = arith.constant 0 : index
    %c0_74 = arith.constant 0 : index
    %158 = vector.load %arg2[%c5_72, %c0_73, %c0_74] : memref<8x8x128xf32, #tpu.memory_space<vmem>>, vector<1x8x128xf32>
    %159 = vector.shape_cast %158 : vector<1x8x128xf32> to vector<8x128xf32>
    %160 = math.log %159 : vector<8x128xf32>
    %cst_75 = arith.constant -1.000000e+02 : f32
    %161 = vector.broadcast %cst_75 : f32 to vector<8x128xf32>
    %162 = arith.maximumf %160, %161 : vector<8x128xf32>
    %cst_76 = arith.constant 1.000000e+00 : f32
    %163 = vector.broadcast %cst_76 : f32 to vector<8x128xf32>
    %164 = arith.subf %163, %159 : vector<8x128xf32>
    %165 = math.log %164 : vector<8x128xf32>
    %cst_77 = arith.constant -1.000000e+02 : f32
    %166 = vector.broadcast %cst_77 : f32 to vector<8x128xf32>
    %167 = arith.maximumf %165, %166 : vector<8x128xf32>
    %cst_78 = arith.constant 0.000000e+00 : f32
    %168 = vector.broadcast %cst_78 : f32 to vector<8x128xf32>
    %169 = arith.cmpf oeq, %98, %168 : vector<8x128xf32>
    %170 = arith.select %169, %162, %167 : vector<8x128xi1>, vector<8x128xf32>
    %171 = arith.subf %157, %170 : vector<8x128xf32>
    %c6_79 = arith.constant 6 : index
    %c0_80 = arith.constant 0 : index
    %c0_81 = arith.constant 0 : index
    %172 = vector.load %arg2[%c6_79, %c0_80, %c0_81] : memref<8x8x128xf32, #tpu.memory_space<vmem>>, vector<1x8x128xf32>
    %173 = vector.shape_cast %172 : vector<1x8x128xf32> to vector<8x128xf32>
    %174 = math.log %173 : vector<8x128xf32>
    %cst_82 = arith.constant -1.000000e+02 : f32
    %175 = vector.broadcast %cst_82 : f32 to vector<8x128xf32>
    %176 = arith.maximumf %174, %175 : vector<8x128xf32>
    %cst_83 = arith.constant 1.000000e+00 : f32
    %177 = vector.broadcast %cst_83 : f32 to vector<8x128xf32>
    %178 = arith.subf %177, %173 : vector<8x128xf32>
    %179 = math.log %178 : vector<8x128xf32>
    %cst_84 = arith.constant -1.000000e+02 : f32
    %180 = vector.broadcast %cst_84 : f32 to vector<8x128xf32>
    %181 = arith.maximumf %179, %180 : vector<8x128xf32>
    %cst_85 = arith.constant 1.000000e+00 : f32
    %182 = vector.broadcast %cst_85 : f32 to vector<8x128xf32>
    %183 = arith.cmpf oeq, %98, %182 : vector<8x128xf32>
    %184 = arith.select %183, %176, %181 : vector<8x128xi1>, vector<8x128xf32>
    %185 = arith.subf %171, %184 : vector<8x128xf32>
    %c7 = arith.constant 7 : index
    %c0_86 = arith.constant 0 : index
    %c0_87 = arith.constant 0 : index
    %186 = vector.load %arg2[%c7, %c0_86, %c0_87] : memref<8x8x128xf32, #tpu.memory_space<vmem>>, vector<1x8x128xf32>
    %187 = vector.shape_cast %186 : vector<1x8x128xf32> to vector<8x128xf32>
    %188 = math.log %187 : vector<8x128xf32>
    %cst_88 = arith.constant -1.000000e+02 : f32
    %189 = vector.broadcast %cst_88 : f32 to vector<8x128xf32>
    %190 = arith.maximumf %188, %189 : vector<8x128xf32>
    %cst_89 = arith.constant 1.000000e+00 : f32
    %191 = vector.broadcast %cst_89 : f32 to vector<8x128xf32>
    %192 = arith.subf %191, %187 : vector<8x128xf32>
    %193 = math.log %192 : vector<8x128xf32>
    %cst_90 = arith.constant -1.000000e+02 : f32
    %194 = vector.broadcast %cst_90 : f32 to vector<8x128xf32>
    %195 = arith.maximumf %193, %194 : vector<8x128xf32>
    %cst_91 = arith.constant 2.000000e+00 : f32
    %196 = vector.broadcast %cst_91 : f32 to vector<8x128xf32>
    %197 = arith.cmpf oeq, %98, %196 : vector<8x128xf32>
    %198 = arith.select %197, %190, %195 : vector<8x128xi1>, vector<8x128xf32>
    %199 = arith.subf %185, %198 : vector<8x128xf32>
    %200 = arith.mulf %94, %199 : vector<8x128xf32>
    %c0_92 = arith.constant 0 : index
    %c0_93 = arith.constant 0 : index
    %c0_94 = arith.constant 0 : index
    %c0_95 = arith.constant 0 : index
    %201 = vector.load %arg4[%c0_92, %c0_93, %c0_94, %c0_95] : memref<1x9x8x128xf32, #tpu.memory_space<vmem>>, vector<1x1x8x128xf32>
    %202 = vector.shape_cast %201 : vector<1x1x8x128xf32> to vector<8x128xf32>
    %203 = vector.shape_cast %133 : vector<8x128xf32> to vector<1x8x128xf32>
    %cst_96 = arith.constant dense<0.000000e+00> : vector<8x128xf32>
    %204 = vector.multi_reduction <add>, %203, %cst_96 [0] : vector<1x8x128xf32> to vector<8x128xf32>
    %205 = arith.addf %202, %204 : vector<8x128xf32>
    %c0_97 = arith.constant 0 : index
    %c0_98 = arith.constant 0 : index
    %c0_99 = arith.constant 0 : index
    %c0_100 = arith.constant 0 : index
    %206 = vector.load %arg4[%c0_97, %c0_98, %c0_99, %c0_100] : memref<1x9x8x128xf32, #tpu.memory_space<vmem>>, vector<1x1x8x128xf32>
    %207 = vector.shape_cast %206 : vector<1x1x8x128xf32> to vector<8x128xf32>
    %208 = vector.shape_cast %205 : vector<8x128xf32> to vector<1x1x8x128xf32>
    tpu.vector_store %arg4[%c0_97, %c0_98, %c0_99, %c0_100], %208 {strides = array<i32>} : memref<1x9x8x128xf32, #tpu.memory_space<vmem>>, vector<1x1x8x128xf32>,
    %c0_101 = arith.constant 0 : index
    %c1_102 = arith.constant 1 : index
    %c0_103 = arith.constant 0 : index
    %c0_104 = arith.constant 0 : index
    %209 = vector.load %arg4[%c0_101, %c1_102, %c0_103, %c0_104] : memref<1x9x8x128xf32, #tpu.memory_space<vmem>>, vector<1x1x8x128xf32>
    %210 = vector.shape_cast %209 : vector<1x1x8x128xf32> to vector<8x128xf32>
    %211 = vector.shape_cast %136 : vector<8x128xf32> to vector<1x8x128xf32>
    %cst_105 = arith.constant dense<0.000000e+00> : vector<8x128xf32>
    %212 = vector.multi_reduction <add>, %211, %cst_105 [0] : vector<1x8x128xf32> to vector<8x128xf32>
    %213 = arith.addf %210, %212 : vector<8x128xf32>
    %c0_106 = arith.constant 0 : index
    %c1_107 = arith.constant 1 : index
    %c0_108 = arith.constant 0 : index
    %c0_109 = arith.constant 0 : index
    %214 = vector.load %arg4[%c0_106, %c1_107, %c0_108, %c0_109] : memref<1x9x8x128xf32, #tpu.memory_space<vmem>>, vector<1x1x8x128xf32>
    %215 = vector.shape_cast %214 : vector<1x1x8x128xf32> to vector<8x128xf32>
    %216 = vector.shape_cast %213 : vector<8x128xf32> to vector<1x1x8x128xf32>
    tpu.vector_store %arg4[%c0_106, %c1_107, %c0_108, %c0_109], %216 {strides = array<i32>} : memref<1x9x8x128xf32, #tpu.memory_space<vmem>>, vector<1x1x8x128xf32>,
    %c0_110 = arith.constant 0 : index
    %c2_111 = arith.constant 2 : index
    %c0_112 = arith.constant 0 : index
    %c0_113 = arith.constant 0 : index
    %217 = vector.load %arg4[%c0_110, %c2_111, %c0_112, %c0_113] : memref<1x9x8x128xf32, #tpu.memory_space<vmem>>, vector<1x1x8x128xf32>
    %218 = vector.shape_cast %217 : vector<1x1x8x128xf32> to vector<8x128xf32>
    %219 = vector.shape_cast %139 : vector<8x128xf32> to vector<1x8x128xf32>
    %cst_114 = arith.constant dense<0.000000e+00> : vector<8x128xf32>
    %220 = vector.multi_reduction <add>, %219, %cst_114 [0] : vector<1x8x128xf32> to vector<8x128xf32>
    %221 = arith.addf %218, %220 : vector<8x128xf32>
    %c0_115 = arith.constant 0 : index
    %c2_116 = arith.constant 2 : index
    %c0_117 = arith.constant 0 : index
    %c0_118 = arith.constant 0 : index
    %222 = vector.load %arg4[%c0_115, %c2_116, %c0_117, %c0_118] : memref<1x9x8x128xf32, #tpu.memory_space<vmem>>, vector<1x1x8x128xf32>
    %223 = vector.shape_cast %222 : vector<1x1x8x128xf32> to vector<8x128xf32>
    %224 = vector.shape_cast %221 : vector<8x128xf32> to vector<1x1x8x128xf32>
    tpu.vector_store %arg4[%c0_115, %c2_116, %c0_117, %c0_118], %224 {strides = array<i32>} : memref<1x9x8x128xf32, #tpu.memory_space<vmem>>, vector<1x1x8x128xf32>,
    %c0_119 = arith.constant 0 : index
    %c3_120 = arith.constant 3 : index
    %c0_121 = arith.constant 0 : index
    %c0_122 = arith.constant 0 : index
    %225 = vector.load %arg4[%c0_119, %c3_120, %c0_121, %c0_122] : memref<1x9x8x128xf32, #tpu.memory_space<vmem>>, vector<1x1x8x128xf32>
    %226 = vector.shape_cast %225 : vector<1x1x8x128xf32> to vector<8x128xf32>
    %227 = vector.shape_cast %142 : vector<8x128xf32> to vector<1x8x128xf32>
    %cst_123 = arith.constant dense<0.000000e+00> : vector<8x128xf32>
    %228 = vector.multi_reduction <add>, %227, %cst_123 [0] : vector<1x8x128xf32> to vector<8x128xf32>
    %229 = arith.addf %226, %228 : vector<8x128xf32>
    %c0_124 = arith.constant 0 : index
    %c3_125 = arith.constant 3 : index
    %c0_126 = arith.constant 0 : index
    %c0_127 = arith.constant 0 : index
    %230 = vector.load %arg4[%c0_124, %c3_125, %c0_126, %c0_127] : memref<1x9x8x128xf32, #tpu.memory_space<vmem>>, vector<1x1x8x128xf32>
    %231 = vector.shape_cast %230 : vector<1x1x8x128xf32> to vector<8x128xf32>
    %232 = vector.shape_cast %229 : vector<8x128xf32> to vector<1x1x8x128xf32>
    tpu.vector_store %arg4[%c0_124, %c3_125, %c0_126, %c0_127], %232 {strides = array<i32>} : memref<1x9x8x128xf32, #tpu.memory_space<vmem>>, vector<1x1x8x128xf32>,
    %c0_128 = arith.constant 0 : index
    %c4_129 = arith.constant 4 : index
    %c0_130 = arith.constant 0 : index
    %c0_131 = arith.constant 0 : index
    %233 = vector.load %arg4[%c0_128, %c4_129, %c0_130, %c0_131] : memref<1x9x8x128xf32, #tpu.memory_space<vmem>>, vector<1x1x8x128xf32>
    %234 = vector.shape_cast %233 : vector<1x1x8x128xf32> to vector<8x128xf32>
    %235 = vector.shape_cast %153 : vector<8x128xf32> to vector<1x8x128xf32>
    %cst_132 = arith.constant dense<0.000000e+00> : vector<8x128xf32>
    %236 = vector.multi_reduction <add>, %235, %cst_132 [0] : vector<1x8x128xf32> to vector<8x128xf32>
    %237 = arith.addf %234, %236 : vector<8x128xf32>
    %c0_133 = arith.constant 0 : index
    %c4_134 = arith.constant 4 : index
    %c0_135 = arith.constant 0 : index
    %c0_136 = arith.constant 0 : index
    %238 = vector.load %arg4[%c0_133, %c4_134, %c0_135, %c0_136] : memref<1x9x8x128xf32, #tpu.memory_space<vmem>>, vector<1x1x8x128xf32>
    %239 = vector.shape_cast %238 : vector<1x1x8x128xf32> to vector<8x128xf32>
    %240 = vector.shape_cast %237 : vector<8x128xf32> to vector<1x1x8x128xf32>
    tpu.vector_store %arg4[%c0_133, %c4_134, %c0_135, %c0_136], %240 {strides = array<i32>} : memref<1x9x8x128xf32, #tpu.memory_space<vmem>>, vector<1x1x8x128xf32>,
    %c0_137 = arith.constant 0 : index
    %c5_138 = arith.constant 5 : index
    %c0_139 = arith.constant 0 : index
    %c0_140 = arith.constant 0 : index
    %241 = vector.load %arg4[%c0_137, %c5_138, %c0_139, %c0_140] : memref<1x9x8x128xf32, #tpu.memory_space<vmem>>, vector<1x1x8x128xf32>
    %242 = vector.shape_cast %241 : vector<1x1x8x128xf32> to vector<8x128xf32>
    %243 = vector.shape_cast %156 : vector<8x128xf32> to vector<1x8x128xf32>
    %cst_141 = arith.constant dense<0.000000e+00> : vector<8x128xf32>
    %244 = vector.multi_reduction <add>, %243, %cst_141 [0] : vector<1x8x128xf32> to vector<8x128xf32>
    %245 = arith.addf %242, %244 : vector<8x128xf32>
    %c0_142 = arith.constant 0 : index
    %c5_143 = arith.constant 5 : index
    %c0_144 = arith.constant 0 : index
    %c0_145 = arith.constant 0 : index
    %246 = vector.load %arg4[%c0_142, %c5_143, %c0_144, %c0_145] : memref<1x9x8x128xf32, #tpu.memory_space<vmem>>, vector<1x1x8x128xf32>
    %247 = vector.shape_cast %246 : vector<1x1x8x128xf32> to vector<8x128xf32>
    %248 = vector.shape_cast %245 : vector<8x128xf32> to vector<1x1x8x128xf32>
    tpu.vector_store %arg4[%c0_142, %c5_143, %c0_144, %c0_145], %248 {strides = array<i32>} : memref<1x9x8x128xf32, #tpu.memory_space<vmem>>, vector<1x1x8x128xf32>,
    %c0_146 = arith.constant 0 : index
    %c6_147 = arith.constant 6 : index
    %c0_148 = arith.constant 0 : index
    %c0_149 = arith.constant 0 : index
    %249 = vector.load %arg4[%c0_146, %c6_147, %c0_148, %c0_149] : memref<1x9x8x128xf32, #tpu.memory_space<vmem>>, vector<1x1x8x128xf32>
    %250 = vector.shape_cast %249 : vector<1x1x8x128xf32> to vector<8x128xf32>
    %251 = vector.shape_cast %200 : vector<8x128xf32> to vector<1x8x128xf32>
    %cst_150 = arith.constant dense<0.000000e+00> : vector<8x128xf32>
    %252 = vector.multi_reduction <add>, %251, %cst_150 [0] : vector<1x8x128xf32> to vector<8x128xf32>
    %253 = arith.addf %250, %252 : vector<8x128xf32>
    %c0_151 = arith.constant 0 : index
    %c6_152 = arith.constant 6 : index
    %c0_153 = arith.constant 0 : index
    %c0_154 = arith.constant 0 : index
    %254 = vector.load %arg4[%c0_151, %c6_152, %c0_153, %c0_154] : memref<1x9x8x128xf32, #tpu.memory_space<vmem>>, vector<1x1x8x128xf32>
    %255 = vector.shape_cast %254 : vector<1x1x8x128xf32> to vector<8x128xf32>
    %256 = vector.shape_cast %253 : vector<8x128xf32> to vector<1x1x8x128xf32>
    tpu.vector_store %arg4[%c0_151, %c6_152, %c0_153, %c0_154], %256 {strides = array<i32>} : memref<1x9x8x128xf32, #tpu.memory_space<vmem>>, vector<1x1x8x128xf32>,
    %c0_155 = arith.constant 0 : index
    %c7_156 = arith.constant 7 : index
    %c0_157 = arith.constant 0 : index
    %c0_158 = arith.constant 0 : index
    %257 = vector.load %arg4[%c0_155, %c7_156, %c0_157, %c0_158] : memref<1x9x8x128xf32, #tpu.memory_space<vmem>>, vector<1x1x8x128xf32>
    %258 = vector.shape_cast %257 : vector<1x1x8x128xf32> to vector<8x128xf32>
    %259 = vector.shape_cast %94 : vector<8x128xf32> to vector<1x8x128xf32>
    %cst_159 = arith.constant dense<0.000000e+00> : vector<8x128xf32>
    %260 = vector.multi_reduction <add>, %259, %cst_159 [0] : vector<1x8x128xf32> to vector<8x128xf32>
    %261 = arith.addf %258, %260 : vector<8x128xf32>
    %c0_160 = arith.constant 0 : index
    %c7_161 = arith.constant 7 : index
    %c0_162 = arith.constant 0 : index
    %c0_163 = arith.constant 0 : index
    %262 = vector.load %arg4[%c0_160, %c7_161, %c0_162, %c0_163] : memref<1x9x8x128xf32, #tpu.memory_space<vmem>>, vector<1x1x8x128xf32>
    %263 = vector.shape_cast %262 : vector<1x1x8x128xf32> to vector<8x128xf32>
    %264 = vector.shape_cast %261 : vector<8x128xf32> to vector<1x1x8x128xf32>
    tpu.vector_store %arg4[%c0_160, %c7_161, %c0_162, %c0_163], %264 {strides = array<i32>} : memref<1x9x8x128xf32, #tpu.memory_space<vmem>>, vector<1x1x8x128xf32>,
    %c0_164 = arith.constant 0 : index
    %c8 = arith.constant 8 : index
    %c0_165 = arith.constant 0 : index
    %c0_166 = arith.constant 0 : index
    %265 = vector.load %arg4[%c0_164, %c8, %c0_165, %c0_166] : memref<1x9x8x128xf32, #tpu.memory_space<vmem>>, vector<1x1x8x128xf32>
    %266 = vector.shape_cast %265 : vector<1x1x8x128xf32> to vector<8x128xf32>
    %267 = vector.shape_cast %96 : vector<8x128xf32> to vector<1x8x128xf32>
    %cst_167 = arith.constant dense<0.000000e+00> : vector<8x128xf32>
    %268 = vector.multi_reduction <add>, %267, %cst_167 [0] : vector<1x8x128xf32> to vector<8x128xf32>
    %269 = arith.addf %266, %268 : vector<8x128xf32>
    %c0_168 = arith.constant 0 : index
    %c8_169 = arith.constant 8 : index
    %c0_170 = arith.constant 0 : index
    %c0_171 = arith.constant 0 : index
    %270 = vector.load %arg4[%c0_168, %c8_169, %c0_170, %c0_171] : memref<1x9x8x128xf32, #tpu.memory_space<vmem>>, vector<1x1x8x128xf32>
    %271 = vector.shape_cast %270 : vector<1x1x8x128xf32> to vector<8x128xf32>
    %272 = vector.shape_cast %269 : vector<8x128xf32> to vector<1x1x8x128xf32>
    tpu.vector_store %arg4[%c0_168, %c8_169, %c0_170, %c0_171], %272 {strides = array<i32>} : memref<1x9x8x128xf32, #tpu.memory_space<vmem>>, vector<1x1x8x128xf32>,
    return
  }
  func.func @transform_0(%arg0: i32, %arg1: i32) -> (i32, i32, i32) {
    %c1_i32 = arith.constant 1 : i32
    %0 = arith.muli %arg0, %c1_i32 : i32
    %1 = arith.addi %0, %arg1 : i32
    %c0_i32 = arith.constant 0 : i32
    %c0_i32_0 = arith.constant 0 : i32
    %c0_i32_1 = arith.constant 0 : i32
    return %c0_i32, %1, %c0_i32_0 : i32, i32, i32
  }
  func.func @transform_1(%arg0: i32, %arg1: i32) -> (i32, i32, i32) {
    %c1_i32 = arith.constant 1 : i32
    %0 = arith.muli %arg0, %c1_i32 : i32
    %1 = arith.addi %0, %arg1 : i32
    %c0_i32 = arith.constant 0 : i32
    %c0_i32_0 = arith.constant 0 : i32
    %c0_i32_1 = arith.constant 0 : i32
    return %c0_i32, %1, %c0_i32_0 : i32, i32, i32
  }
  func.func @transform_2(%arg0: i32, %arg1: i32) -> (i32, i32, i32, i32) {
    %c0_i32 = arith.constant 0 : i32
    %c0_i32_0 = arith.constant 0 : i32
    %c0_i32_1 = arith.constant 0 : i32
    %c0_i32_2 = arith.constant 0 : i32
    return %arg0, %c0_i32, %c0_i32_0, %c0_i32_1 : i32, i32, i32, i32
  }
}

</mosaic_0001>

<bundles_post_ra>
// kernel: mul.22
= control target key start
LH: loop header
LB: loop body
LE: loop exit
PB: predicated region body
PF: predicated region fallthrough
CT: control target
= control target key end

     0   :  { %s34_s0 = inlined_call_operand.vmem [shape: f32[4], index: 0, kind: input, shape index: {}]   ;;  %s35_s1 = inlined_call_operand.vmem [shape: f32[4], index: 1, kind: input, shape index: {}]   ;;  %s36_s2 = inlined_call_operand.vmem [shape: f32[4], index: 2, kind: output, shape index: {}]  }
   0x1   :  { %v3_v0 = vld [vmem:[%s34_s0] sm:$0x1] }
   0x2   :  { %v4_v1 = vld [vmem:[%s35_s1] sm:$0x1] }
   0x3   :  { %v7_v2 = vmul.f32 %v4_v1, %v3_v0 }
   0x5   :  { %9 = vst [vmem:[%s36_s2] sm:$0x1] %v7_v2 }

// kernel: _lambda_.3
= control target key start
LH: loop header
LB: loop body
LE: loop exit
PB: predicated region body
PF: predicated region fallthrough
CT: control target
= control target key end

     0   :  { %s781_s9 = smov 0   ;;  %s783_s10 = smov 0   ;;  %s902_s0 = inlined_call_operand.vmem [shape: f32[8,16,128], index: 0, kind: input, shape index: {}]   ;;  %s903_s1 = inlined_call_operand.vmem [shape: f32[7,16,128], index: 1, kind: input, shape index: {}]   ;;  %s904_s2 = inlined_call_operand.vmem [shape: f32[2,9,8,128], index: 2, kind: output, shape index: {}]  }
   0x1   :  { %s785_s11 = smov 0   ;;  %s787_s12 = smov 0  }
   0x2   :  { %s789_s13 = smov 0  }
   0x3 LB: > { %s24_s14 = sadd.s32 1, %s758_s12  ;;  %p40_p1 = scmp.ne.s32.totalorder %s750_s10, %s746_s9  ;;  %s762_s13 = sphi %s789_s13, %s12_s13   ;;  %s758_s12 = sphi %s787_s12, %s909_s12   ;;  %s754_s11 = sphi %s785_s11, %s908_s11   ;;  %s750_s10 = sphi %s783_s10, %s907_s10   ;;  %s746_s9 = sphi %s781_s9, %s906_s9  }
   0x4   : > { %p26_p0 = scmp.ge.s32.totalorder %s24_s14, 2  ;;  %p41_p2 = scmp.eq.s32.totalorder %s762_s13, 0 }
   0x5   : > { %s33_s17 = sadd.s32 1, %s750_s10  ;;  %p616_p5 = scmp.ge.s32.totalorder %s762_s13, 2 }
   0x6   : > { %s911_s14 = smov (%p26_p0, %s24_s14), 0  ;;  %p812_p3 = por %p41_p2, %p40_p1 }
   0x7   : > { %s30_s16 = ssub.s32 %s758_s12, %s911_s14  ;;  %120 = sbr.rel (%p616_p5) target bundleno = 28 (0x1c), region = 16 }
   0x8   : > { %p31_p4 = scmp.eq.s32.totalorder %s30_s16, 0 }
   0xa   : > { %s820_s18 = scalar_select %p31_p4, %s750_s10, %s33_s17  }
   0xc   : > { %123 = sbr.rel (!%p812_p3) target bundleno = 20 (0x14), region = 20  ;;  %s125_s19 = sand.u32 (%p812_p3), 1, %s750_s10  }
   0xd   : > { %s618_s20 = sshll.u32 (%p812_p3), %s758_s12, 3  ;;  %s617_s21 = sshll.u32 (%p812_p3), %s125_s19, 6 }
   0xe   : > { %s130_s24 = scalar_lea.vmem (%p812_p3), %s902_s0, %s618_s20  ;;  %s127_s25 = scalar_lea.vmem (%p812_p3), [#allocation2], %s617_s21 }
   0xf   : > { %v173_v0 = vld [vmem:[%s130_s24] sm:$0xff] (%p812_p3)  ;;  %v175_v1 = vld [vmem:[%s130_s24 + $0x10] sm:$0xff] (%p812_p3) }
  0x10   : > { %v177_v2 = vld [vmem:[%s130_s24 + $0x20] sm:$0xff] (%p812_p3)  ;;  %174 = vst [vmem:[%s127_s25] sm:$0xff] (%p812_p3), %v173_v0  ;;  %176 = vst [vmem:[%s127_s25 + $0x8] sm:$0xff] (%p812_p3), %v175_v1  ;;  %v179_v3 = vld [vmem:[%s130_s24 + $0x30] sm:$0xff] (%p812_p3) }
  0x11   : > { %178 = vst [vmem:[%s127_s25 + $0x10] sm:$0xff] %v177_v2  ;;  %v181_v4 = vld [vmem:[%s130_s24 + $0x40] sm:$0xff]  ;;  %v183_v5 = vld [vmem:[%s130_s24 + $0x50] sm:$0xff]  ;;  %180 = vst [vmem:[%s127_s25 + $0x18] sm:$0xff] %v179_v3 }
  0x12   : > { %182 = vst [vmem:[%s127_s25 + $0x20] sm:$0xff] %v181_v4  ;;  %184 = vst [vmem:[%s127_s25 + $0x28] sm:$0xff] %v183_v5  ;;  %v185_v6 = vld [vmem:[%s130_s24 + $0x60] sm:$0xff]  ;;  %v187_v7 = vld [vmem:[%s130_s24 + $0x70] sm:$0xff] }
  0x13   : > { %186 = vst [vmem:[%s127_s25 + $0x30] sm:$0xff] %v185_v6  ;;  %188 = vst [vmem:[%s127_s25 + $0x38] sm:$0xff] %v187_v7 }
  0x14 PF: > { %194 = sbr.rel (!%p812_p3) target bundleno = 28 (0x1c), region = 58  ;;  %s196_s26 = sand.u32 (%p812_p3), 1, %s750_s10  }
  0x15   : > { %s619_s27 = sshll.u32 (%p812_p3), %s758_s12, 3  ;;  %s658_s28 = smul.u32 (%p812_p3), 56, %s196_s26 }
  0x16   : > { %s201_s3 = scalar_lea.vmem (%p812_p3), %s903_s1, %s619_s27 }
  0x17   : > { %v242_v8 = vld [vmem:[%s201_s3] sm:$0xff] (%p812_p3)  ;;  %v244_v9 = vld [vmem:[%s201_s3 + $0x10] sm:$0xff] (%p812_p3)  ;;  %s198_s4 = scalar_lea.vmem (%p812_p3), [#allocation3], %s658_s28 }
  0x18   : > { %v246_v10 = vld [vmem:[%s201_s3 + $0x20] sm:$0xff] (%p812_p3)  ;;  %v248_v11 = vld [vmem:[%s201_s3 + $0x30] sm:$0xff] (%p812_p3)  ;;  %243 = vst [vmem:[%s198_s4] sm:$0xff] (%p812_p3), %v242_v8  ;;  %245 = vst [vmem:[%s198_s4 + $0x8] sm:$0xff] (%p812_p3), %v244_v9 }
  0x19   : > { %v250_v12 = vld [vmem:[%s201_s3 + $0x40] sm:$0xff]  ;;  %v252_v13 = vld [vmem:[%s201_s3 + $0x50] sm:$0xff]  ;;  %247 = vst [vmem:[%s198_s4 + $0x10] sm:$0xff] %v246_v10  ;;  %249 = vst [vmem:[%s198_s4 + $0x18] sm:$0xff] %v248_v11 }
  0x1a   : > { %251 = vst [vmem:[%s198_s4 + $0x20] sm:$0xff] %v250_v12  ;;  %253 = vst [vmem:[%s198_s4 + $0x28] sm:$0xff] %v252_v13  ;;  %v254_v14 = vld [vmem:[%s201_s3 + $0x60] sm:$0xff] }
  0x1b   : > { %255 = vst [vmem:[%s198_s4 + $0x30] sm:$0xff] %v254_v14 }
  0x1c PF: > { %p620_p6 = scmp.ge.s32.totalorder %s762_s13, 1  ;;  %p260_p7 = scmp.lt.s32.totalorder %s762_s13, 3 }
  0x1e   : > { %p261_p8 = pnand %p620_p6, %p260_p7 }
  0x1f   : > { %p301_p9 = scmp.lt.s32.totalorder (!%p261_p8), %s754_s11, 1  ;;  %s267_s5 = sand.u32 (!%p261_p8), 1, %s746_s9  }
  0x20   : > { %264 = sbr.rel (%p261_p8) target bundleno = 125 (0x7d), region = 96  ;;  %s621_s6 = sshll.u32 (!%p261_p8), %s267_s5, 6 }
  0x21   : > { %s659_s7 = smul.u32 (!%p261_p8), 56, %s267_s5  ;;  %s623_s16 = sshll.u32 (!%p261_p8), %s754_s11, 10 }
  0x22   : > { %s853_s21 = scalar_lea.vmem (!%p261_p8), [#allocation2], %s621_s6 }
  0x23   : > { %s843_s17 = scalar_lea.vmem (!%p261_p8), [#allocation3], %s659_s7 }
  0x25   : > { %v321_v15 = vlaneseq  ;;  %s302_s8 = scalar_select %p301_p9, %s754_s11, 1  ;;  %v846_v19 = vld [vmem:[%s843_s17 + $0x20] sm:$0xff]  ;;  %v326_v20 = vstv %s623_s16  ;;  %v637_v25 = vld [vmem:[%s853_s21 + $0x28] sm:$0xff]  ;;  %v638_v26 = vld [vmem:[%s853_s21 + $0x30] sm:$0xff] }
  0x26   : > { %v636_v22 = vld [vmem:[%s853_s21 + $0x20] sm:$0xff]  ;;  %v639_v27 = vld [vmem:[%s853_s21 + $0x38] sm:$0xff]  ;;  %v448_v28 = vsub.f32 1.0, %v637_v25  ;;  %v460_v29 = vsub.f32 1.0, %v638_v26  ;;  %v632_v41 = vld [vmem:[%s843_s17 + $0x30] sm:$0xff] }
  0x27   : > { %v322_v16 = vshrl.u32 %v321_v15, 7  ;;  %s660_s15 = smul.u32 72, %s302_s8  ;;  %v324_v17 = vand.u32 127, %v321_v15  ;;  %704 = vlog2.f32 %v636_v22  ;;  %v435_v24 = vsub.f32 1.0, %v636_v22  ;;  %v631_v31 = vld [vmem:[%s843_s17 + $0x28] sm:$0xff] }
  0x28   : > { %706 = vlog2.f32 %v637_v25  ;;  %v472_v32 = vsub.f32 1.0, %v639_v27  ;;  %v385_v38 = vld [vmem:[%s853_s21] sm:$0xff]  ;;  %vm452_vm2 = vcmp.eq.f32.partialorder %v632_v41, 0.0  ;;  %vm464_vm3 = vcmp.eq.f32.partialorder %v632_v41, 1.0 }
  0x29   : > { %v325_v18 = vmul.u32 128, %v322_v16  ;;  %s851_s9 = scalar_lea.vmem %s904_s2, %s660_s15  ;;  %708 = vlog2.f32 %v435_v24  ;;  %v386_v46 = vmul.f32 0.25, %v385_v38  ;;  %vm476_vm5 = vcmp.eq.f32.partialorder %v632_v41, 2.0 }
  0x2a   : > { %653 = vst [vmem:[%s851_s9 + $0x38] sm:$0xff] %v846_v19  ;;  %710 = vlog2.f32 %v448_v28  ;;  %655 = vst [vmem:[%s851_s9 + $0x40] sm:$0xff] %v631_v31 }
  0x2b   : > { %v327_v21 = vadd.s32 %v326_v20, %v325_v18  ;;  %712 = vlog2.f32 %v638_v26 }
  0x2c   : > { %714 = vlog2.f32 %v460_v29 }
  0x2d   : > { %v328_v23 = vadd.s32 %v327_v21, %v324_v17  ;;  %716 = vlog2.f32 %v639_v27  ;;  %v372_v17 = vld [vmem:[%s843_s17] sm:$0xff]  ;;  %v633_v27 = vld [vmem:[%s853_s21 + $0x8] sm:$0xff] }
  0x2e   : > { %718 = vlog2.f32 %v472_v32 }
  0x2f   : > { %v329_v30 = vcvt.s32.f32 %v328_v23 }
  0x31   : > { %v330_v33 = vmul.f32 0.125, %v329_v30 }
  0x33   : > { %v331_v34 = vfloor.f32 %v330_v33 }
  0x34   : > { %v705_v39 = vpop.eup %704 }
  0x35   : > { %v332_v35 = vmul.f32 8.0, %v331_v34  ;;  %v624_v36 = vadd.f32 -1.0, %v331_v34  ;;  %v707_v42 = vpop.eup %706  ;;  %v433_v44 = vmul.f32 0.6931472, %v705_v39 }
  0x36   : > { %v709_v45 = vpop.eup %708  ;;  %v446_v47 = vmul.f32 0.6931472, %v707_v42 }
  0x37   : > { %v333_v37 = vsub.f32 %v329_v30, %v332_v35  ;;  %v711_v48 = vpop.eup %710  ;;  %v434_v50 = vmax.f32 %v433_v44, -100.0  ;;  %v437_v51 = vmul.f32 0.6931472, %v709_v45  ;;  %v627_v44 = vld [vmem:[%s843_s17 + $0x8] sm:$0xff] }
  0x38   : > { %v713_v52 = vpop.eup %712  ;;  %v447_v55 = vmax.f32 %v446_v47, -100.0  ;;  %v450_v56 = vmul.f32 0.6931472, %v711_v48 }
  0x39   : > { %vm334_vm0 = vcmp.lt.f32.partialorder %v333_v37, 0.0  ;;  %vm337_vm1 = vcmp.ge.f32.partialorder %v333_v37, 8.0  ;;  %v715_v57 = vpop.eup %714  ;;  %v439_v58 = vsub.f32 0.0, %v434_v50  ;;  %v438_v59 = vmax.f32 %v437_v51, -100.0 }
  0x3a   : > { %v336_v40 = vsel %vm334_vm0, %v624_v36, %v331_v34  ;;  %v458_v60 = vmul.f32 0.6931472, %v713_v52  ;;  %v717_v61 = vpop.eup %716  ;;  %v451_v0 = vmax.f32 %v450_v56, -100.0  ;;  %v462_v1 = vmul.f32 0.6931472, %v715_v57 }
  0x3b   : > { %v338_v43 = vadd.f32 1.0, %v336_v40  ;;  %v719_v2 = vpop.eup %718  ;;  %v440_v3 = vmul.f32 %v846_v19, %v439_v58  ;;  %v441_v4 = vsub.f32 0.0, %v438_v59  ;;  %v470_v6 = vmul.f32 0.6931472, %v717_v61 }
  0x3c   : > { %v459_v5 = vmax.f32 %v458_v60, -100.0  ;;  %v453_v10 = vsel %vm452_vm2, %v447_v55, %v451_v0  ;;  %v463_v13 = vmax.f32 %v462_v1, -100.0  ;;  %v474_v16 = vmul.f32 0.6931472, %v719_v2  ;;  %v635_v55 = vld [vmem:[%s853_s21 + $0x18] sm:$0xff] }
  0x3d   : > { %v339_v49 = vsel %vm337_vm1, %v338_v43, %v336_v40  ;;  %v442_v11 = vmul.f32 %v631_v31, %v441_v4  ;;  %v454_v12 = vsub.f32 0.0, %v453_v10  ;;  %647 = vst [vmem:[%s851_s9 + $0x20] sm:$0xff] %v440_v3  ;;  %v471_v20 = vmax.f32 %v470_v6, -100.0 }
  0x3e   : > { %v340_v53 = vmul.f32 8.0, %v339_v49  ;;  %v342_v54 = vmul.f32 0.125, %v339_v49  ;;  %v465_v18 = vsel %vm464_vm3, %v459_v5, %v463_v13  ;;  %v475_v24 = vmax.f32 %v474_v16, -100.0 }
  0x3f   : > { %v466_v22 = vsub.f32 %v454_v12, %v465_v18  ;;  %649 = vst [vmem:[%s851_s9 + $0x28] sm:$0xff] %v442_v11  ;;  %v392_v34 = vmul.f32 0.25, %v633_v27  ;;  %v764_v56 = vmov 0.027027028   ;;  %v765_v58 = vmov 0.01724138  }
  0x40   : > { %v341_v62 = vsub.f32 %v329_v30, %v340_v53  ;;  %v343_v63 = vfloor.f32 %v342_v54  ;;  %v477_v28 = vsel %vm476_vm5, %v471_v20, %v475_v24  ;;  %v634_v54 = vld [vmem:[%s853_s21 + $0x10] sm:$0xff] }
  0x41   : > { %v478_v31 = vsub.f32 %v466_v22, %v477_v28  ;;  %v629_v11 = vld [vmem:[%s843_s17 + $0x18] sm:$0xff] }
  0x42   : > { %v344_v7 = vmul.f32 8.0, %v343_v63  ;;  %v387_v8 = vsub.f32 %v386_v46, %v341_v62  ;;  %v625_v9 = vadd.f32 -1.0, %v343_v63 }
  0x43   : > { %v479_v36 = vmul.f32 %v846_v19, %v478_v31 }
  0x44   : > { %v345_v14 = vsub.f32 %v339_v49, %v344_v7  ;;  %v388_v15 = vadd.f32 0.5, %v387_v8  ;;  %v628_v7 = vld [vmem:[%s843_s17 + $0x10] sm:$0xff] }
  0x45   : > { %651 = vst [vmem:[%s851_s9 + $0x30] sm:$0xff] %v479_v36 }
  0x46   : > { %v389_v21 = vmul.f32 0.5, %v388_v15  ;;  %vm346_vm4 = vcmp.lt.f32.partialorder %v345_v14, 0.0  ;;  %vm349_vm6 = vcmp.ge.f32.partialorder %v345_v14, 8.0 }
  0x47   : > { %v348_v23 = vsel %vm346_vm4, %v625_v9, %v343_v63 }
  0x48   : > { %v420_v25 = vsub.f32 %v389_v21, %v372_v17  ;;  %v350_v26 = vadd.f32 1.0, %v348_v23 }
  0x4a   : > { %v421_v29 = vmul.f32 %v420_v25, %v420_v25  ;;  %v351_v30 = vsel %vm349_vm6, %v350_v26, %v348_v23 }
  0x4b   : > { %v352_v32 = vmul.f32 8.0, %v351_v30  ;;  %v354_v33 = vmul.f32 0.33333334, %v351_v30 }
  0x4c   : > { %v422_v35 = vmul.f32 %v846_v19, %v421_v29 }
  0x4d   : > { %v353_v37 = vsub.f32 %v339_v49, %v352_v32  ;;  %v355_v38 = vfloor.f32 %v354_v33 }
  0x4e   : > { %483 = vst [vmem:[%s851_s9] sm:$0xff] %v422_v35 }
  0x4f   : > { %v356_v39 = vmul.f32 3.0, %v355_v38  ;;  %v393_v40 = vsub.f32 %v392_v34, %v353_v37  ;;  %v626_v41 = vadd.f32 -1.0, %v355_v38 }
  0x51   : > { %v357_v42 = vsub.f32 %v351_v30, %v356_v39  ;;  %v394_v43 = vadd.f32 0.5, %v393_v40 }
  0x53   : > { %vm358_vm7 = vcmp.lt.f32.partialorder %v357_v42, 0.0  ;;  %v395_v45 = vmul.f32 0.5, %v394_v43  ;;  %vm361_vm8 = vcmp.ge.f32.partialorder %v357_v42, 3.0 }
  0x54   : > { %v360_v46 = vsel %vm358_vm7, %v626_v41, %v355_v38 }
  0x55   : > { %v362_v47 = vadd.f32 1.0, %v360_v46  ;;  %v423_v48 = vsub.f32 %v395_v45, %v627_v44 }
  0x57   : > { %v363_v50 = vsel %vm361_vm8, %v362_v47, %v360_v46  ;;  %v424_v49 = vmul.f32 %v423_v48, %v423_v48 }
  0x58   : > { %v364_v51 = vmul.f32 3.0, %v363_v50 }
  0x59   : > { %v425_v52 = vmul.f32 %v846_v19, %v424_v49 }
  0x5a   : > { %v365_v53 = vsub.f32 %v351_v30, %v364_v51 }
  0x5b   : > { %641 = vst [vmem:[%s851_s9 + $0x8] sm:$0xff] %v425_v52 }
  0x5c   : > { %vm366_vm9 = vcmp.eq.f32.partialorder %v365_v53, 0.0  ;;  %vm369_vm10 = vcmp.eq.f32.partialorder %v365_v53, 1.0 }
  0x5d   : > { %v367_v57 = vsel %vm366_vm9, 0.1, %v764_v56  ;;  %v368_v59 = vsel %vm366_vm9, 0.071428575, %v765_v58 }
  0x5e   : > { %v370_v60 = vsel %vm369_vm10, 0.04347826, %v367_v57  ;;  %v371_v61 = vsel %vm369_vm10, 0.037037037, %v368_v59 }
  0x5f   : > { %v398_v62 = vmul.f32 %v634_v54, %v370_v60  ;;  %v409_v63 = vmul.f32 %v635_v55, %v371_v61 }
  0x61   : > { %720 = vrsqrt.f32 %v398_v62  ;;  %vm401_vm11 = vcmp.eq.f32.partialorder %v398_v62, inf  ;;  %v404_v1 = vand.u32 2147483648, %v398_v62  ;;  %vm403_vm12 = vcmp.eq.f32.partialorder %v398_v62, 0.0 }
  0x62   : > { %722 = vrsqrt.f32 %v409_v63  ;;  %vm412_vm13 = vcmp.eq.f32.partialorder %v409_v63, inf  ;;  %v415_v4 = vand.u32 2147483648, %v409_v63  ;;  %vm414_vm14 = vcmp.eq.f32.partialorder %v409_v63, 0.0 }
  0x6e   : > { %v721_v0 = vpop.eup %720 }
  0x6f   : > { %v723_v2 = vpop.eup %722  ;;  %v400_v3 = vmul.f32 %v721_v0, %v398_v62 }
  0x70   : > { %v411_v5 = vmul.f32 %v723_v2, %v409_v63 }
  0x71   : > { %v402_v6 = vsel %vm401_vm11, %v398_v62, %v400_v3 }
  0x72   : > { %v405_v8 = vsel %vm403_vm12, %v404_v1, %v402_v6  ;;  %v413_v9 = vsel %vm412_vm13, %v409_v63, %v411_v5 }
  0x73   : > { %v406_v10 = vmul.f32 0.5, %v405_v8  ;;  %v416_v12 = vsel %vm414_vm14, %v415_v4, %v413_v9 }
  0x74   : > { %v417_v13 = vmul.f32 0.5, %v416_v12 }
  0x75   : > { %v426_v14 = vsub.f32 %v406_v10, %v628_v7 }
  0x76   : > { %v429_v15 = vsub.f32 %v417_v13, %v629_v11 }
  0x77   : > { %v427_v16 = vmul.f32 %v426_v14, %v426_v14 }
  0x78   : > { %v430_v17 = vmul.f32 %v429_v15, %v429_v15 }
  0x79   : > { %v428_v18 = vmul.f32 %v846_v19, %v427_v16 }
  0x7a   : > { %v431_v20 = vmul.f32 %v846_v19, %v430_v17 }
  0x7b   : > { %643 = vst [vmem:[%s851_s9 + $0x10] sm:$0xff] %v428_v18 }
  0x7c   : > { %645 = vst [vmem:[%s851_s9 + $0x18] sm:$0xff] %v431_v20 }
  0x7d PF: > { %s12_s13 = sadd.s32 1, %s762_s13   ;;  %s906_s9 = smov %s750_s10 }
  0x7e   : > { %p9_p10 = scmp.ge.s32.totalorder %s12_s13, 4   ;;  %s907_s10 = smov %s820_s18 }
  0x7f   : > { %s908_s11 = smov %s758_s12  ;;  %s909_s12 = smov %s911_s14 }
  0x80   :  { %11 = sbr.rel (!%p9_p10) target bundleno = 3 (0x3), region = 172 }

// kernel: _lambda_.2
= control target key start
LH: loop header
LB: loop body
LE: loop exit
PB: predicated region body
PF: predicated region fallthrough
CT: control target
= control target key end

     0   :  { %s781_s9 = smov 0   ;;  %s783_s10 = smov 0   ;;  %s902_s0 = inlined_call_operand.vmem [shape: f32[8,16,128], index: 0, kind: input, shape index: {}]   ;;  %s903_s1 = inlined_call_operand.vmem [shape: f32[7,16,128], index: 1, kind: input, shape index: {}]   ;;  %s904_s2 = inlined_call_operand.vmem [shape: f32[2,9,8,128], index: 2, kind: output, shape index: {}]  }
   0x1   :  { %s785_s11 = smov 0   ;;  %s787_s12 = smov 0  }
   0x2   :  { %s789_s13 = smov 0  }
   0x3 LB: > { %s24_s14 = sadd.s32 1, %s758_s12  ;;  %p40_p1 = scmp.ne.s32.totalorder %s750_s10, %s746_s9  ;;  %s762_s13 = sphi %s789_s13, %s12_s13   ;;  %s758_s12 = sphi %s787_s12, %s909_s12   ;;  %s754_s11 = sphi %s785_s11, %s908_s11   ;;  %s750_s10 = sphi %s783_s10, %s907_s10   ;;  %s746_s9 = sphi %s781_s9, %s906_s9  }
   0x4   : > { %p26_p0 = scmp.ge.s32.totalorder %s24_s14, 2  ;;  %p41_p2 = scmp.eq.s32.totalorder %s762_s13, 0 }
   0x5   : > { %s33_s17 = sadd.s32 1, %s750_s10  ;;  %p616_p5 = scmp.ge.s32.totalorder %s762_s13, 2 }
   0x6   : > { %s911_s14 = smov (%p26_p0, %s24_s14), 0  ;;  %p812_p3 = por %p41_p2, %p40_p1 }
   0x7   : > { %s30_s16 = ssub.s32 %s758_s12, %s911_s14  ;;  %120 = sbr.rel (%p616_p5) target bundleno = 28 (0x1c), region = 16 }
   0x8   : > { %p31_p4 = scmp.eq.s32.totalorder %s30_s16, 0 }
   0xa   : > { %s820_s18 = scalar_select %p31_p4, %s750_s10, %s33_s17  }
   0xc   : > { %123 = sbr.rel (!%p812_p3) target bundleno = 20 (0x14), region = 20  ;;  %s125_s19 = sand.u32 (%p812_p3), 1, %s750_s10  }
   0xd   : > { %s618_s20 = sshll.u32 (%p812_p3), %s758_s12, 3  ;;  %s617_s21 = sshll.u32 (%p812_p3), %s125_s19, 6 }
   0xe   : > { %s130_s24 = scalar_lea.vmem (%p812_p3), %s902_s0, %s618_s20  ;;  %s127_s25 = scalar_lea.vmem (%p812_p3), [#allocation2], %s617_s21 }
   0xf   : > { %v173_v0 = vld [vmem:[%s130_s24] sm:$0xff] (%p812_p3)  ;;  %v175_v1 = vld [vmem:[%s130_s24 + $0x10] sm:$0xff] (%p812_p3) }
  0x10   : > { %v177_v2 = vld [vmem:[%s130_s24 + $0x20] sm:$0xff] (%p812_p3)  ;;  %174 = vst [vmem:[%s127_s25] sm:$0xff] (%p812_p3), %v173_v0  ;;  %176 = vst [vmem:[%s127_s25 + $0x8] sm:$0xff] (%p812_p3), %v175_v1  ;;  %v179_v3 = vld [vmem:[%s130_s24 + $0x30] sm:$0xff] (%p812_p3) }
  0x11   : > { %178 = vst [vmem:[%s127_s25 + $0x10] sm:$0xff] %v177_v2  ;;  %v181_v4 = vld [vmem:[%s130_s24 + $0x40] sm:$0xff]  ;;  %v183_v5 = vld [vmem:[%s130_s24 + $0x50] sm:$0xff]  ;;  %180 = vst [vmem:[%s127_s25 + $0x18] sm:$0xff] %v179_v3 }
  0x12   : > { %182 = vst [vmem:[%s127_s25 + $0x20] sm:$0xff] %v181_v4  ;;  %184 = vst [vmem:[%s127_s25 + $0x28] sm:$0xff] %v183_v5  ;;  %v185_v6 = vld [vmem:[%s130_s24 + $0x60] sm:$0xff]  ;;  %v187_v7 = vld [vmem:[%s130_s24 + $0x70] sm:$0xff] }
  0x13   : > { %186 = vst [vmem:[%s127_s25 + $0x30] sm:$0xff] %v185_v6  ;;  %188 = vst [vmem:[%s127_s25 + $0x38] sm:$0xff] %v187_v7 }
  0x14 PF: > { %194 = sbr.rel (!%p812_p3) target bundleno = 28 (0x1c), region = 58  ;;  %s196_s26 = sand.u32 (%p812_p3), 1, %s750_s10  }
  0x15   : > { %s619_s27 = sshll.u32 (%p812_p3), %s758_s12, 3  ;;  %s658_s28 = smul.u32 (%p812_p3), 56, %s196_s26 }
  0x16   : > { %s201_s3 = scalar_lea.vmem (%p812_p3), %s903_s1, %s619_s27 }
  0x17   : > { %v242_v8 = vld [vmem:[%s201_s3] sm:$0xff] (%p812_p3)  ;;  %v244_v9 = vld [vmem:[%s201_s3 + $0x10] sm:$0xff] (%p812_p3)  ;;  %s198_s4 = scalar_lea.vmem (%p812_p3), [#allocation3], %s658_s28 }
  0x18   : > { %v246_v10 = vld [vmem:[%s201_s3 + $0x20] sm:$0xff] (%p812_p3)  ;;  %v248_v11 = vld [vmem:[%s201_s3 + $0x30] sm:$0xff] (%p812_p3)  ;;  %243 = vst [vmem:[%s198_s4] sm:$0xff] (%p812_p3), %v242_v8  ;;  %245 = vst [vmem:[%s198_s4 + $0x8] sm:$0xff] (%p812_p3), %v244_v9 }
  0x19   : > { %v250_v12 = vld [vmem:[%s201_s3 + $0x40] sm:$0xff]  ;;  %v252_v13 = vld [vmem:[%s201_s3 + $0x50] sm:$0xff]  ;;  %247 = vst [vmem:[%s198_s4 + $0x10] sm:$0xff] %v246_v10  ;;  %249 = vst [vmem:[%s198_s4 + $0x18] sm:$0xff] %v248_v11 }
  0x1a   : > { %251 = vst [vmem:[%s198_s4 + $0x20] sm:$0xff] %v250_v12  ;;  %253 = vst [vmem:[%s198_s4 + $0x28] sm:$0xff] %v252_v13  ;;  %v254_v14 = vld [vmem:[%s201_s3 + $0x60] sm:$0xff] }
  0x1b   : > { %255 = vst [vmem:[%s198_s4 + $0x30] sm:$0xff] %v254_v14 }
  0x1c PF: > { %p620_p6 = scmp.ge.s32.totalorder %s762_s13, 1  ;;  %p260_p7 = scmp.lt.s32.totalorder %s762_s13, 3 }
  0x1e   : > { %p261_p8 = pnand %p620_p6, %p260_p7 }
  0x1f   : > { %p301_p9 = scmp.lt.s32.totalorder (!%p261_p8), %s754_s11, 1  ;;  %s267_s5 = sand.u32 (!%p261_p8), 1, %s746_s9  }
  0x20   : > { %264 = sbr.rel (%p261_p8) target bundleno = 125 (0x7d), region = 96  ;;  %s621_s6 = sshll.u32 (!%p261_p8), %s267_s5, 6 }
  0x21   : > { %s659_s7 = smul.u32 (!%p261_p8), 56, %s267_s5  ;;  %s623_s16 = sshll.u32 (!%p261_p8), %s754_s11, 10 }
  0x22   : > { %s853_s21 = scalar_lea.vmem (!%p261_p8), [#allocation2], %s621_s6 }
  0x23   : > { %s843_s17 = scalar_lea.vmem (!%p261_p8), [#allocation3], %s659_s7 }
  0x25   : > { %v321_v15 = vlaneseq  ;;  %s302_s8 = scalar_select %p301_p9, %s754_s11, 1  ;;  %v846_v19 = vld [vmem:[%s843_s17 + $0x20] sm:$0xff]  ;;  %v326_v20 = vstv %s623_s16  ;;  %v637_v25 = vld [vmem:[%s853_s21 + $0x28] sm:$0xff]  ;;  %v638_v26 = vld [vmem:[%s853_s21 + $0x30] sm:$0xff] }
  0x26   : > { %v636_v22 = vld [vmem:[%s853_s21 + $0x20] sm:$0xff]  ;;  %v639_v27 = vld [vmem:[%s853_s21 + $0x38] sm:$0xff]  ;;  %v448_v28 = vsub.f32 1.0, %v637_v25  ;;  %v460_v29 = vsub.f32 1.0, %v638_v26  ;;  %v632_v41 = vld [vmem:[%s843_s17 + $0x30] sm:$0xff] }
  0x27   : > { %v322_v16 = vshrl.u32 %v321_v15, 7  ;;  %s660_s15 = smul.u32 72, %s302_s8  ;;  %v324_v17 = vand.u32 127, %v321_v15  ;;  %704 = vlog2.f32 %v636_v22  ;;  %v435_v24 = vsub.f32 1.0, %v636_v22  ;;  %v631_v31 = vld [vmem:[%s843_s17 + $0x28] sm:$0xff] }
  0x28   : > { %706 = vlog2.f32 %v637_v25  ;;  %v472_v32 = vsub.f32 1.0, %v639_v27  ;;  %v385_v38 = vld [vmem:[%s853_s21] sm:$0xff]  ;;  %vm452_vm2 = vcmp.eq.f32.partialorder %v632_v41, 0.0  ;;  %vm464_vm3 = vcmp.eq.f32.partialorder %v632_v41, 1.0 }
  0x29   : > { %v325_v18 = vmul.u32 128, %v322_v16  ;;  %s851_s9 = scalar_lea.vmem %s904_s2, %s660_s15  ;;  %708 = vlog2.f32 %v435_v24  ;;  %v386_v46 = vmul.f32 0.125, %v385_v38  ;;  %vm476_vm5 = vcmp.eq.f32.partialorder %v632_v41, 2.0 }
  0x2a   : > { %653 = vst [vmem:[%s851_s9 + $0x38] sm:$0xff] %v846_v19  ;;  %710 = vlog2.f32 %v448_v28  ;;  %655 = vst [vmem:[%s851_s9 + $0x40] sm:$0xff] %v631_v31 }
  0x2b   : > { %v327_v21 = vadd.s32 %v326_v20, %v325_v18  ;;  %712 = vlog2.f32 %v638_v26 }
  0x2c   : > { %714 = vlog2.f32 %v460_v29 }
  0x2d   : > { %v328_v23 = vadd.s32 %v327_v21, %v324_v17  ;;  %716 = vlog2.f32 %v639_v27  ;;  %v372_v17 = vld [vmem:[%s843_s17] sm:$0xff]  ;;  %v633_v27 = vld [vmem:[%s853_s21 + $0x8] sm:$0xff] }
  0x2e   : > { %718 = vlog2.f32 %v472_v32 }
  0x2f   : > { %v329_v30 = vcvt.s32.f32 %v328_v23 }
  0x31   : > { %v330_v33 = vmul.f32 0.25, %v329_v30 }
  0x33   : > { %v331_v34 = vfloor.f32 %v330_v33 }
  0x34   : > { %v705_v39 = vpop.eup %704 }
  0x35   : > { %v332_v35 = vmul.f32 4.0, %v331_v34  ;;  %v624_v36 = vadd.f32 -1.0, %v331_v34  ;;  %v707_v42 = vpop.eup %706  ;;  %v433_v44 = vmul.f32 0.6931472, %v705_v39 }
  0x36   : > { %v709_v45 = vpop.eup %708  ;;  %v446_v47 = vmul.f32 0.6931472, %v707_v42 }
  0x37   : > { %v333_v37 = vsub.f32 %v329_v30, %v332_v35  ;;  %v711_v48 = vpop.eup %710  ;;  %v434_v50 = vmax.f32 %v433_v44, -100.0  ;;  %v437_v51 = vmul.f32 0.6931472, %v709_v45  ;;  %v627_v44 = vld [vmem:[%s843_s17 + $0x8] sm:$0xff] }
  0x38   : > { %v713_v52 = vpop.eup %712  ;;  %v447_v55 = vmax.f32 %v446_v47, -100.0  ;;  %v450_v56 = vmul.f32 0.6931472, %v711_v48 }
  0x39   : > { %vm334_vm0 = vcmp.lt.f32.partialorder %v333_v37, 0.0  ;;  %vm337_vm1 = vcmp.ge.f32.partialorder %v333_v37, 4.0  ;;  %v715_v57 = vpop.eup %714  ;;  %v439_v58 = vsub.f32 0.0, %v434_v50  ;;  %v438_v59 = vmax.f32 %v437_v51, -100.0 }
  0x3a   : > { %v336_v40 = vsel %vm334_vm0, %v624_v36, %v331_v34  ;;  %v458_v60 = vmul.f32 0.6931472, %v713_v52  ;;  %v717_v61 = vpop.eup %716  ;;  %v451_v0 = vmax.f32 %v450_v56, -100.0  ;;  %v462_v1 = vmul.f32 0.6931472, %v715_v57 }
  0x3b   : > { %v338_v43 = vadd.f32 1.0, %v336_v40  ;;  %v719_v2 = vpop.eup %718  ;;  %v440_v3 = vmul.f32 %v846_v19, %v439_v58  ;;  %v441_v4 = vsub.f32 0.0, %v438_v59  ;;  %v470_v6 = vmul.f32 0.6931472, %v717_v61 }
  0x3c   : > { %v459_v5 = vmax.f32 %v458_v60, -100.0  ;;  %v453_v10 = vsel %vm452_vm2, %v447_v55, %v451_v0  ;;  %v463_v13 = vmax.f32 %v462_v1, -100.0  ;;  %v474_v16 = vmul.f32 0.6931472, %v719_v2  ;;  %v635_v55 = vld [vmem:[%s853_s21 + $0x18] sm:$0xff] }
  0x3d   : > { %v339_v49 = vsel %vm337_vm1, %v338_v43, %v336_v40  ;;  %v442_v11 = vmul.f32 %v631_v31, %v441_v4  ;;  %v454_v12 = vsub.f32 0.0, %v453_v10  ;;  %647 = vst [vmem:[%s851_s9 + $0x20] sm:$0xff] %v440_v3  ;;  %v471_v20 = vmax.f32 %v470_v6, -100.0 }
  0x3e   : > { %v340_v53 = vmul.f32 4.0, %v339_v49  ;;  %v342_v54 = vmul.f32 0.25, %v339_v49  ;;  %v465_v18 = vsel %vm464_vm3, %v459_v5, %v463_v13  ;;  %v475_v24 = vmax.f32 %v474_v16, -100.0 }
  0x3f   : > { %v466_v22 = vsub.f32 %v454_v12, %v465_v18  ;;  %649 = vst [vmem:[%s851_s9 + $0x28] sm:$0xff] %v442_v11  ;;  %v392_v34 = vmul.f32 0.125, %v633_v27  ;;  %v764_v56 = vmov 0.0029069767   ;;  %v765_v58 = vmov 0.0031347962  }
  0x40   : > { %v341_v62 = vsub.f32 %v329_v30, %v340_v53  ;;  %v343_v63 = vfloor.f32 %v342_v54  ;;  %v477_v28 = vsel %vm476_vm5, %v471_v20, %v475_v24  ;;  %v634_v54 = vld [vmem:[%s853_s21 + $0x10] sm:$0xff] }
  0x41   : > { %v478_v31 = vsub.f32 %v466_v22, %v477_v28  ;;  %v629_v11 = vld [vmem:[%s843_s17 + $0x18] sm:$0xff] }
  0x42   : > { %v344_v7 = vmul.f32 4.0, %v343_v63  ;;  %v387_v8 = vsub.f32 %v386_v46, %v341_v62  ;;  %v625_v9 = vadd.f32 -1.0, %v343_v63 }
  0x43   : > { %v479_v36 = vmul.f32 %v846_v19, %v478_v31 }
  0x44   : > { %v345_v14 = vsub.f32 %v339_v49, %v344_v7  ;;  %v388_v15 = vadd.f32 0.5, %v387_v8  ;;  %v628_v7 = vld [vmem:[%s843_s17 + $0x10] sm:$0xff] }
  0x45   : > { %651 = vst [vmem:[%s851_s9 + $0x30] sm:$0xff] %v479_v36 }
  0x46   : > { %v389_v21 = vmul.f32 0.5, %v388_v15  ;;  %vm346_vm4 = vcmp.lt.f32.partialorder %v345_v14, 0.0  ;;  %vm349_vm6 = vcmp.ge.f32.partialorder %v345_v14, 4.0 }
  0x47   : > { %v348_v23 = vsel %vm346_vm4, %v625_v9, %v343_v63 }
  0x48   : > { %v420_v25 = vsub.f32 %v389_v21, %v372_v17  ;;  %v350_v26 = vadd.f32 1.0, %v348_v23 }
  0x4a   : > { %v421_v29 = vmul.f32 %v420_v25, %v420_v25  ;;  %v351_v30 = vsel %vm349_vm6, %v350_v26, %v348_v23 }
  0x4b   : > { %v352_v32 = vmul.f32 4.0, %v351_v30  ;;  %v354_v33 = vmul.f32 0.33333334, %v351_v30 }
  0x4c   : > { %v422_v35 = vmul.f32 %v846_v19, %v421_v29 }
  0x4d   : > { %v353_v37 = vsub.f32 %v339_v49, %v352_v32  ;;  %v355_v38 = vfloor.f32 %v354_v33 }
  0x4e   : > { %483 = vst [vmem:[%s851_s9] sm:$0xff] %v422_v35 }
  0x4f   : > { %v356_v39 = vmul.f32 3.0, %v355_v38  ;;  %v393_v40 = vsub.f32 %v392_v34, %v353_v37  ;;  %v626_v41 = vadd.f32 -1.0, %v355_v38 }
  0x51   : > { %v357_v42 = vsub.f32 %v351_v30, %v356_v39  ;;  %v394_v43 = vadd.f32 0.5, %v393_v40 }
  0x53   : > { %vm358_vm7 = vcmp.lt.f32.partialorder %v357_v42, 0.0  ;;  %v395_v45 = vmul.f32 0.5, %v394_v43  ;;  %vm361_vm8 = vcmp.ge.f32.partialorder %v357_v42, 3.0 }
  0x54   : > { %v360_v46 = vsel %vm358_vm7, %v626_v41, %v355_v38 }
  0x55   : > { %v362_v47 = vadd.f32 1.0, %v360_v46  ;;  %v423_v48 = vsub.f32 %v395_v45, %v627_v44 }
  0x57   : > { %v363_v50 = vsel %vm361_vm8, %v362_v47, %v360_v46  ;;  %v424_v49 = vmul.f32 %v423_v48, %v423_v48 }
  0x58   : > { %v364_v51 = vmul.f32 3.0, %v363_v50 }
  0x59   : > { %v425_v52 = vmul.f32 %v846_v19, %v424_v49 }
  0x5a   : > { %v365_v53 = vsub.f32 %v351_v30, %v364_v51 }
  0x5b   : > { %641 = vst [vmem:[%s851_s9 + $0x8] sm:$0xff] %v425_v52 }
  0x5c   : > { %vm366_vm9 = vcmp.eq.f32.partialorder %v365_v53, 0.0  ;;  %vm369_vm10 = vcmp.eq.f32.partialorder %v365_v53, 1.0 }
  0x5d   : > { %v367_v57 = vsel %vm366_vm9, 0.012345679, %v764_v56  ;;  %v368_v59 = vsel %vm366_vm9, 0.0121951215, %v765_v58 }
  0x5e   : > { %v370_v60 = vsel %vm369_vm10, 0.0074074073, %v367_v57  ;;  %v371_v61 = vsel %vm369_vm10, 0.00591716, %v368_v59 }
  0x5f   : > { %v398_v62 = vmul.f32 %v634_v54, %v370_v60  ;;  %v409_v63 = vmul.f32 %v635_v55, %v371_v61 }
  0x61   : > { %720 = vrsqrt.f32 %v398_v62  ;;  %vm401_vm11 = vcmp.eq.f32.partialorder %v398_v62, inf  ;;  %v404_v1 = vand.u32 2147483648, %v398_v62  ;;  %vm403_vm12 = vcmp.eq.f32.partialorder %v398_v62, 0.0 }
  0x62   : > { %722 = vrsqrt.f32 %v409_v63  ;;  %vm412_vm13 = vcmp.eq.f32.partialorder %v409_v63, inf  ;;  %v415_v4 = vand.u32 2147483648, %v409_v63  ;;  %vm414_vm14 = vcmp.eq.f32.partialorder %v409_v63, 0.0 }
  0x6e   : > { %v721_v0 = vpop.eup %720 }
  0x6f   : > { %v723_v2 = vpop.eup %722  ;;  %v400_v3 = vmul.f32 %v721_v0, %v398_v62 }
  0x70   : > { %v411_v5 = vmul.f32 %v723_v2, %v409_v63 }
  0x71   : > { %v402_v6 = vsel %vm401_vm11, %v398_v62, %v400_v3 }
  0x72   : > { %v405_v8 = vsel %vm403_vm12, %v404_v1, %v402_v6  ;;  %v413_v9 = vsel %vm412_vm13, %v409_v63, %v411_v5 }
  0x73   : > { %v406_v10 = vmul.f32 0.5, %v405_v8  ;;  %v416_v12 = vsel %vm414_vm14, %v415_v4, %v413_v9 }
  0x74   : > { %v417_v13 = vmul.f32 0.5, %v416_v12 }
  0x75   : > { %v426_v14 = vsub.f32 %v406_v10, %v628_v7 }
  0x76   : > { %v429_v15 = vsub.f32 %v417_v13, %v629_v11 }
  0x77   : > { %v427_v16 = vmul.f32 %v426_v14, %v426_v14 }
  0x78   : > { %v430_v17 = vmul.f32 %v429_v15, %v429_v15 }
  0x79   : > { %v428_v18 = vmul.f32 %v846_v19, %v427_v16 }
  0x7a   : > { %v431_v20 = vmul.f32 %v846_v19, %v430_v17 }
  0x7b   : > { %643 = vst [vmem:[%s851_s9 + $0x10] sm:$0xff] %v428_v18 }
  0x7c   : > { %645 = vst [vmem:[%s851_s9 + $0x18] sm:$0xff] %v431_v20 }
  0x7d PF: > { %s12_s13 = sadd.s32 1, %s762_s13   ;;  %s906_s9 = smov %s750_s10 }
  0x7e   : > { %p9_p10 = scmp.ge.s32.totalorder %s12_s13, 4   ;;  %s907_s10 = smov %s820_s18 }
  0x7f   : > { %s908_s11 = smov %s758_s12  ;;  %s909_s12 = smov %s911_s14 }
  0x80   :  { %11 = sbr.rel (!%p9_p10) target bundleno = 3 (0x3), region = 172 }

</bundles_post_ra>
